<compile_context>
chip_gen: v5e
topology: v5e:2x2
jax: 0.10.0
libtpu: 0.0.40
codegen_flags: <defaults>
</compile_context>

<pallas_src>
import jax
import jax.numpy as jnp
from jax import lax
from jax.experimental import pallas as pl
from jax.experimental.pallas import tpu as pltpu


def _upsample_kernel(x_ref, w_ref, o_ref, xp_ref, col_ref):
    # x_ref:   (Bt, H, W, Cin)           input tile (compute dtype)
    # w_ref:   (9*Cin, Cout)             conv weight, rows (dy, dx, cin),
    #                                    cols permuted to (i, j, cps)
    # o_ref:   (Bt, H, 2, W, 2*Cps)      fused conv + PixelShuffle output tile
    # xp_ref:  (Bt, H+2, W+2, Cin) f32   zero-padded input (VMEM scratch)
    # col_ref: (Bt*H*W, 9*Cin)           im2col matrix (VMEM scratch)
    Bt, H, W, Cin = x_ref.shape
    M = Bt * H * W
    Cps2 = o_ref.shape[4]          # == 2 * Cps

    # 1) Zero-pad the 3x3 halo in VMEM.  One dense vreg fill + one dense
    #    interior store (dense stores beat a strided border-only write).
    xp_ref[...] = jnp.zeros(xp_ref.shape, xp_ref.dtype)
    xp_ref[:, 1:H + 1, 1:W + 1, :] = x_ref[...].astype(xp_ref.dtype)

    # 2) im2col: rows ordered (b, h, w), cols ordered (dy, dx, cin).
    #    Static slices only; the (Bt,H,W)->M merge is a leading-dim reshape
    #    (relayout-free, Cin stays on lanes).
    for t, (dy, dx) in enumerate((dy, dx) for dy in range(3) for dx in range(3)):
        patch = xp_ref[:, dy:dy + H, dx:dx + W, :].reshape(M, Cin)
        col_ref[:, t * Cin:(t + 1) * Cin] = patch.astype(col_ref.dtype)

    # 3) Single MXU matmul, K = 9*Cin, f32 accumulation.
    acc = jnp.dot(col_ref[...], w_ref[...],
                  preferred_element_type=jnp.float32)
    acc = acc.astype(o_ref.dtype)              # (M, 4*Cps), cols (i, j, cps)

    # 4) Fused PixelShuffle(2): output rows of parity i are the static lane
    #    slice [i*2Cps:(i+1)*2Cps] (weights were column-permuted for this).
    o_ref[:, :, 0, :, :] = acc[:, :Cps2].reshape(Bt, H, W, Cps2)
    o_ref[:, :, 1, :, :] = acc[:, Cps2:].reshape(Bt, H, W, Cps2)


def _pick_batch_tile(B, H, W, Cin, Cps, cdt, out_dtype,
                     budget_bytes=24 * 1024 * 1024):
    """Largest divisor of B whose VMEM footprint (scratch + double-buffered
    pipeline buffers) stays under `budget_bytes`."""
    cbytes = jnp.dtype(cdt).itemsize
    obytes = jnp.dtype(out_dtype).itemsize
    best = 1
    for bt in range(1, B + 1):
        if B % bt:
            continue
        m = bt * H * W
        need = (bt * (H + 2) * (W + 2) * Cin * 4        # xp scratch (f32)
                + m * 9 * Cin * cbytes                  # im2col scratch
                + m * 4 * Cps * 4                       # matmul result (f32)
                + 2 * m * Cin * cbytes                  # input double buffer
                + 2 * m * 4 * Cps * obytes              # output double buffer
                + 2 * 9 * Cin * 4 * Cps * cbytes)       # weight double buffer
        if need <= budget_bytes:
            best = bt
    return best


def upsample_forward(x, H, W, w_oihw, *, compute_dtype=None, batch_tile=None):
    """Pallas implementation of Upsample.forward.

    x:      (B, H*W, C)
    w_oihw: (2C, C, 3, 3)   PyTorch Conv2d weight (OIHW), bias-free
    returns (B, 4*H*W, C // 2)
    """
    B, HW, Cin = x.shape
    assert HW == H * W
    Cout = w_oihw.shape[0]
    assert Cout % 4 == 0 and w_oihw.shape[1] == Cin
    Cps = Cout // 4
    out_dtype = x.dtype
    cdt = jnp.dtype(compute_dtype) if compute_dtype is not None else x.dtype

    # 'b (h w) c -> b h w c' is a free reshape; the kernel works in NHWC.
    x_nhwc = x.reshape(B, H, W, Cin).astype(cdt)

    # Weight: OIHW -> (9*Cin, Cout) with rows in im2col (dy, dx, cin) order and
    # columns permuted from (cps, i, j) to (i, j, cps) so that PixelShuffle
    # becomes two static lane slices inside the kernel.  (Tiny tensor.)
    wmat = jnp.transpose(w_oihw, (2, 3, 1, 0)).reshape(9 * Cin, Cout)
    wmat = wmat.reshape(9 * Cin, Cps, 2, 2).transpose(0, 2, 3, 1)
    wmat = wmat.reshape(9 * Cin, Cout).astype(cdt)

    # Fold batch into the matmul M dimension: largest batch tile that fits the
    # VMEM budget (fewer grid steps => less per-step overhead).
    Bt = batch_tile if batch_tile is not None else _pick_batch_tile(
        B, H, W, Cin, Cps, cdt, out_dtype)
    assert B % Bt == 0

    out5 = pl.pallas_call(
        _upsample_kernel,
        out_shape=jax.ShapeDtypeStruct((B, H, 2, W, 2 * Cps), out_dtype),
        grid_spec=pltpu.PrefetchScalarGridSpec(
            num_scalar_prefetch=0,
            grid=(B // Bt,),
            in_specs=[
                pl.BlockSpec((Bt, H, W, Cin), lambda g: (g, 0, 0, 0)),
                pl.BlockSpec((9 * Cin, Cout), lambda g: (0, 0)),
            ],
            out_specs=pl.BlockSpec((Bt, H, 2, W, 2 * Cps),
                                   lambda g: (g, 0, 0, 0, 0)),
            scratch_shapes=[
                pltpu.VMEM((Bt, H + 2, W + 2, Cin), jnp.float32),
                pltpu.VMEM((Bt * H * W, 9 * Cin), cdt),
            ],
        ),
        compiler_params=pltpu.CompilerParams(
            dimension_semantics=("parallel",),
            vmem_limit_bytes=32 * 1024 * 1024,
        ),
    )(x_nhwc, wmat)

    # (B, H, 2, W, 2*Cps) is byte-identical (row-major) to (B, 2H, 2W, Cps),
    # so this reshape is a free bitcast — no post-kernel transpose / HBM pass.
    return out5.reshape(B, 4 * H * W, Cps)


def upsample_reference(x, H, W, w_oihw):
    """Pure-JAX NCHW reference replicating the PyTorch module exactly."""
    B, HW, C = x.shape
    x_nchw = jnp.transpose(x, (0, 2, 1)).reshape(B, C, H, W)
    conv = lax.conv_general_dilated(
        x_nchw, w_oihw, window_strides=(1, 1), padding=((1, 1), (1, 1)),
        dimension_numbers=("NCHW", "OIHW", "NCHW"))
    Cout = w_oihw.shape[0]
    Cps = Cout // 4
    # PixelShuffle(2)
    y = conv.reshape(B, Cps, 2, 2, H, W)
    y = jnp.transpose(y, (0, 1, 4, 2, 5, 3)).reshape(B, Cps, 2 * H, 2 * W)
    # b c h w -> b (h w) c
    return jnp.transpose(y.reshape(B, Cps, 4 * H * W), (0, 2, 1))


if __name__ == "__main__":
    key = jax.random.PRNGKey(0)
    B, n_feat, H, W = 2, 8, 8, 8

    kx, kw = jax.random.split(key)
    x = jax.random.normal(kx, (B, H * W, n_feat), dtype=jnp.float32)
    # Conv2d(n_feat, 2*n_feat, 3, bias=False) weight, OIHW, deterministic init.
    fan_in = n_feat * 3 * 3
    bound = 1.0 / (fan_in ** 0.5)
    w_oihw = jax.random.uniform(kw, (2 * n_feat, n_feat, 3, 3),
                                dtype=jnp.float32, minval=-bound, maxval=bound)

    ref = upsample_reference(x, H, W, w_oihw)

    # f32 path (exact match to the reference).
    out = jax.block_until_ready(upsample_forward(x, H, W, w_oihw))
    assert out.shape == (B, 4 * H * W, n_feat // 2), out.shape
    assert jnp.allclose(out, ref, atol=1e-5, rtol=1e-5), \
        float(jnp.max(jnp.abs(out - ref)))

    # bf16 MXU path (v6e/v7x): bf16 matmul operands, f32 accumulation.
    out_bf16 = jax.block_until_ready(
        upsample_forward(x, H, W, w_oihw, compute_dtype=jnp.bfloat16))
    assert out_bf16.shape == out.shape
    assert jnp.allclose(out_bf16, ref, atol=5e-2, rtol=5e-2), \
        float(jnp.max(jnp.abs(out_bf16 - ref)))

    print("KERNEL_OK")
</pallas_src>

<mosaic_0001>
module attributes {stable_mosaic.version = 11 : i64} {
  func.func @_upsample_kernel(%arg0: i32, %arg1: memref<2x8x8x8xf32, #tpu.memory_space<vmem>>, %arg2: memref<72x16xf32, #tpu.memory_space<vmem>>, %arg3: memref<2x8x2x8x8xf32, #tpu.memory_space<vmem>>, %arg4: memref<2x10x10x8xf32, #tpu.memory_space<vmem>>, %arg5: memref<128x72xf32, #tpu.memory_space<vmem>>) attributes {dimension_semantics = [#tpu.dimension_semantics<parallel>], iteration_bounds = array<i64: 1>, scalar_prefetch = 0 : i64, scratch_operands = 2 : i64, tpu.core_type = #tpu.core_type<tc>, window_params = [{transform_indices = @transform_0, window_bounds = array<i64: 2, 8, 8, 8>}, {pipeline_mode = #tpu.pipeline_mode<synchronous>, transform_indices = @transform_1, window_bounds = array<i64: 72, 16>}, {transform_indices = @transform_2, window_bounds = array<i64: 2, 8, 2, 8, 8>}]} {
    %cst = arith.constant 0.000000e+00 : f32
    %0 = vector.broadcast %cst : f32 to vector<2x10x10x8xf32>
    %c0 = arith.constant 0 : index
    %c0_0 = arith.constant 0 : index
    %c0_1 = arith.constant 0 : index
    %c0_2 = arith.constant 0 : index
    %1 = vector.load %arg4[%c0, %c0_0, %c0_1, %c0_2] : memref<2x10x10x8xf32, #tpu.memory_space<vmem>>, vector<2x10x10x8xf32>
    tpu.vector_store %arg4[%c0, %c0_0, %c0_1, %c0_2], %0 {strides = array<i32>} : memref<2x10x10x8xf32, #tpu.memory_space<vmem>>, vector<2x10x10x8xf32>,
    %c0_3 = arith.constant 0 : index
    %c0_4 = arith.constant 0 : index
    %c0_5 = arith.constant 0 : index
    %c0_6 = arith.constant 0 : index
    %2 = vector.load %arg1[%c0_3, %c0_4, %c0_5, %c0_6] : memref<2x8x8x8xf32, #tpu.memory_space<vmem>>, vector<2x8x8x8xf32>
    %c0_7 = arith.constant 0 : index
    %c1 = arith.constant 1 : index
    %c1_8 = arith.constant 1 : index
    %c0_9 = arith.constant 0 : index
    %3 = vector.load %arg4[%c0_7, %c1, %c1_8, %c0_9] : memref<2x10x10x8xf32, #tpu.memory_space<vmem>>, vector<2x8x8x8xf32>
    tpu.vector_store %arg4[%c0_7, %c1, %c1_8, %c0_9], %2 {strides = array<i32>} : memref<2x10x10x8xf32, #tpu.memory_space<vmem>>, vector<2x8x8x8xf32>,
    %c0_10 = arith.constant 0 : index
    %c0_11 = arith.constant 0 : index
    %c0_12 = arith.constant 0 : index
    %c0_13 = arith.constant 0 : index
    %4 = vector.load %arg4[%c0_10, %c0_11, %c0_12, %c0_13] : memref<2x10x10x8xf32, #tpu.memory_space<vmem>>, vector<2x8x8x8xf32>
    %5 = vector.shape_cast %4 : vector<2x8x8x8xf32> to vector<128x8xf32>
    %c0_14 = arith.constant 0 : index
    %c0_15 = arith.constant 0 : index
    %6 = vector.load %arg5[%c0_14, %c0_15] : memref<128x72xf32, #tpu.memory_space<vmem>>, vector<128x8xf32>
    tpu.vector_store %arg5[%c0_14, %c0_15], %5 {strides = array<i32>} : memref<128x72xf32, #tpu.memory_space<vmem>>, vector<128x8xf32>,
    %c0_16 = arith.constant 0 : index
    %c0_17 = arith.constant 0 : index
    %c1_18 = arith.constant 1 : index
    %c0_19 = arith.constant 0 : index
    %7 = vector.load %arg4[%c0_16, %c0_17, %c1_18, %c0_19] : memref<2x10x10x8xf32, #tpu.memory_space<vmem>>, vector<2x8x8x8xf32>
    %8 = vector.shape_cast %7 : vector<2x8x8x8xf32> to vector<128x8xf32>
    %c0_20 = arith.constant 0 : index
    %c8 = arith.constant 8 : index
    %9 = vector.load %arg5[%c0_20, %c8] : memref<128x72xf32, #tpu.memory_space<vmem>>, vector<128x8xf32>
    tpu.vector_store %arg5[%c0_20, %c8], %8 {strides = array<i32>} : memref<128x72xf32, #tpu.memory_space<vmem>>, vector<128x8xf32>,
    %c0_21 = arith.constant 0 : index
    %c0_22 = arith.constant 0 : index
    %c2 = arith.constant 2 : index
    %c0_23 = arith.constant 0 : index
    %10 = vector.load %arg4[%c0_21, %c0_22, %c2, %c0_23] : memref<2x10x10x8xf32, #tpu.memory_space<vmem>>, vector<2x8x8x8xf32>
    %11 = vector.shape_cast %10 : vector<2x8x8x8xf32> to vector<128x8xf32>
    %c0_24 = arith.constant 0 : index
    %c16 = arith.constant 16 : index
    %12 = vector.load %arg5[%c0_24, %c16] : memref<128x72xf32, #tpu.memory_space<vmem>>, vector<128x8xf32>
    tpu.vector_store %arg5[%c0_24, %c16], %11 {strides = array<i32>} : memref<128x72xf32, #tpu.memory_space<vmem>>, vector<128x8xf32>,
    %c0_25 = arith.constant 0 : index
    %c1_26 = arith.constant 1 : index
    %c0_27 = arith.constant 0 : index
    %c0_28 = arith.constant 0 : index
    %13 = vector.load %arg4[%c0_25, %c1_26, %c0_27, %c0_28] : memref<2x10x10x8xf32, #tpu.memory_space<vmem>>, vector<2x8x8x8xf32>
    %14 = vector.shape_cast %13 : vector<2x8x8x8xf32> to vector<128x8xf32>
    %c0_29 = arith.constant 0 : index
    %c24 = arith.constant 24 : index
    %15 = vector.load %arg5[%c0_29, %c24] : memref<128x72xf32, #tpu.memory_space<vmem>>, vector<128x8xf32>
    tpu.vector_store %arg5[%c0_29, %c24], %14 {strides = array<i32>} : memref<128x72xf32, #tpu.memory_space<vmem>>, vector<128x8xf32>,
    %c0_30 = arith.constant 0 : index
    %c1_31 = arith.constant 1 : index
    %c1_32 = arith.constant 1 : index
    %c0_33 = arith.constant 0 : index
    %16 = vector.load %arg4[%c0_30, %c1_31, %c1_32, %c0_33] : memref<2x10x10x8xf32, #tpu.memory_space<vmem>>, vector<2x8x8x8xf32>
    %17 = vector.shape_cast %16 : vector<2x8x8x8xf32> to vector<128x8xf32>
    %c0_34 = arith.constant 0 : index
    %c32 = arith.constant 32 : index
    %18 = vector.load %arg5[%c0_34, %c32] : memref<128x72xf32, #tpu.memory_space<vmem>>, vector<128x8xf32>
    tpu.vector_store %arg5[%c0_34, %c32], %17 {strides = array<i32>} : memref<128x72xf32, #tpu.memory_space<vmem>>, vector<128x8xf32>,
    %c0_35 = arith.constant 0 : index
    %c1_36 = arith.constant 1 : index
    %c2_37 = arith.constant 2 : index
    %c0_38 = arith.constant 0 : index
    %19 = vector.load %arg4[%c0_35, %c1_36, %c2_37, %c0_38] : memref<2x10x10x8xf32, #tpu.memory_space<vmem>>, vector<2x8x8x8xf32>
    %20 = vector.shape_cast %19 : vector<2x8x8x8xf32> to vector<128x8xf32>
    %c0_39 = arith.constant 0 : index
    %c40 = arith.constant 40 : index
    %21 = vector.load %arg5[%c0_39, %c40] : memref<128x72xf32, #tpu.memory_space<vmem>>, vector<128x8xf32>
    tpu.vector_store %arg5[%c0_39, %c40], %20 {strides = array<i32>} : memref<128x72xf32, #tpu.memory_space<vmem>>, vector<128x8xf32>,
    %c0_40 = arith.constant 0 : index
    %c2_41 = arith.constant 2 : index
    %c0_42 = arith.constant 0 : index
    %c0_43 = arith.constant 0 : index
    %22 = vector.load %arg4[%c0_40, %c2_41, %c0_42, %c0_43] : memref<2x10x10x8xf32, #tpu.memory_space<vmem>>, vector<2x8x8x8xf32>
    %23 = vector.shape_cast %22 : vector<2x8x8x8xf32> to vector<128x8xf32>
    %c0_44 = arith.constant 0 : index
    %c48 = arith.constant 48 : index
    %24 = vector.load %arg5[%c0_44, %c48] : memref<128x72xf32, #tpu.memory_space<vmem>>, vector<128x8xf32>
    tpu.vector_store %arg5[%c0_44, %c48], %23 {strides = array<i32>} : memref<128x72xf32, #tpu.memory_space<vmem>>, vector<128x8xf32>,
    %c0_45 = arith.constant 0 : index
    %c2_46 = arith.constant 2 : index
    %c1_47 = arith.constant 1 : index
    %c0_48 = arith.constant 0 : index
    %25 = vector.load %arg4[%c0_45, %c2_46, %c1_47, %c0_48] : memref<2x10x10x8xf32, #tpu.memory_space<vmem>>, vector<2x8x8x8xf32>
    %26 = vector.shape_cast %25 : vector<2x8x8x8xf32> to vector<128x8xf32>
    %c0_49 = arith.constant 0 : index
    %c56 = arith.constant 56 : index
    %27 = vector.load %arg5[%c0_49, %c56] : memref<128x72xf32, #tpu.memory_space<vmem>>, vector<128x8xf32>
    tpu.vector_store %arg5[%c0_49, %c56], %26 {strides = array<i32>} : memref<128x72xf32, #tpu.memory_space<vmem>>, vector<128x8xf32>,
    %c0_50 = arith.constant 0 : index
    %c2_51 = arith.constant 2 : index
    %c2_52 = arith.constant 2 : index
    %c0_53 = arith.constant 0 : index
    %28 = vector.load %arg4[%c0_50, %c2_51, %c2_52, %c0_53] : memref<2x10x10x8xf32, #tpu.memory_space<vmem>>, vector<2x8x8x8xf32>
    %29 = vector.shape_cast %28 : vector<2x8x8x8xf32> to vector<128x8xf32>
    %c0_54 = arith.constant 0 : index
    %c64 = arith.constant 64 : index
    %30 = vector.load %arg5[%c0_54, %c64] : memref<128x72xf32, #tpu.memory_space<vmem>>, vector<128x8xf32>
    tpu.vector_store %arg5[%c0_54, %c64], %29 {strides = array<i32>} : memref<128x72xf32, #tpu.memory_space<vmem>>, vector<128x8xf32>,
    %c0_55 = arith.constant 0 : index
    %c0_56 = arith.constant 0 : index
    %31 = vector.load %arg5[%c0_55, %c0_56] : memref<128x72xf32, #tpu.memory_space<vmem>>, vector<128x72xf32>
    %c0_57 = arith.constant 0 : index
    %c0_58 = arith.constant 0 : index
    %32 = vector.load %arg2[%c0_57, %c0_58] : memref<72x16xf32, #tpu.memory_space<vmem>>, vector<72x16xf32>
    %cst_59 = arith.constant dense<0.000000e+00> : vector<128x16xf32>
    %33 = tpu.matmul %31, %32, %cst_59 {dimension_numbers = #tpu.dot_dimension_numbers<[1], [0], [0], [1], [0, 0, 1, 1], [], []>} : vector<128x72xf32>, vector<72x16xf32>, vector<128x16xf32> -> vector<128x16xf32>
    %34 = vector.extract_strided_slice %33 {offsets = [0, 0], sizes = [128, 8], strides = [1, 1]} : vector<128x16xf32> to vector<128x8xf32>
    %35 = vector.shape_cast %34 : vector<128x8xf32> to vector<2x8x8x8xf32>
    %c0_60 = arith.constant 0 : index
    %c0_61 = arith.constant 0 : index
    %c0_62 = arith.constant 0 : index
    %c0_63 = arith.constant 0 : index
    %c0_64 = arith.constant 0 : index
    %36 = vector.load %arg3[%c0_60, %c0_61, %c0_62, %c0_63, %c0_64] : memref<2x8x2x8x8xf32, #tpu.memory_space<vmem>>, vector<2x8x1x8x8xf32>
    %37 = vector.shape_cast %36 : vector<2x8x1x8x8xf32> to vector<2x8x8x8xf32>
    %38 = vector.shape_cast %35 : vector<2x8x8x8xf32> to vector<2x8x1x8x8xf32>
    tpu.vector_store %arg3[%c0_60, %c0_61, %c0_62, %c0_63, %c0_64], %38 {strides = array<i32>} : memref<2x8x2x8x8xf32, #tpu.memory_space<vmem>>, vector<2x8x1x8x8xf32>,
    %39 = vector.extract_strided_slice %33 {offsets = [0, 8], sizes = [128, 8], strides = [1, 1]} : vector<128x16xf32> to vector<128x8xf32>
    %40 = vector.shape_cast %39 : vector<128x8xf32> to vector<2x8x8x8xf32>
    %c0_65 = arith.constant 0 : index
    %c0_66 = arith.constant 0 : index
    %c1_67 = arith.constant 1 : index
    %c0_68 = arith.constant 0 : index
    %c0_69 = arith.constant 0 : index
    %41 = vector.load %arg3[%c0_65, %c0_66, %c1_67, %c0_68, %c0_69] : memref<2x8x2x8x8xf32, #tpu.memory_space<vmem>>, vector<2x8x1x8x8xf32>
    %42 = vector.shape_cast %41 : vector<2x8x1x8x8xf32> to vector<2x8x8x8xf32>
    %43 = vector.shape_cast %40 : vector<2x8x8x8xf32> to vector<2x8x1x8x8xf32>
    tpu.vector_store %arg3[%c0_65, %c0_66, %c1_67, %c0_68, %c0_69], %43 {strides = array<i32>} : memref<2x8x2x8x8xf32, #tpu.memory_space<vmem>>, vector<2x8x1x8x8xf32>,
    return
  }
  func.func @transform_0(%arg0: i32) -> (i32, i32, i32, i32) {
    %c0_i32 = arith.constant 0 : i32
    %c0_i32_0 = arith.constant 0 : i32
    %c0_i32_1 = arith.constant 0 : i32
    %c0_i32_2 = arith.constant 0 : i32
    return %arg0, %c0_i32, %c0_i32_0, %c0_i32_1 : i32, i32, i32, i32
  }
  func.func @transform_1(%arg0: i32) -> (i32, i32) {
    %c0_i32 = arith.constant 0 : i32
    %c0_i32_0 = arith.constant 0 : i32
    %c0_i32_1 = arith.constant 0 : i32
    return %c0_i32, %c0_i32_0 : i32, i32
  }
  func.func @transform_2(%arg0: i32) -> (i32, i32, i32, i32, i32) {
    %c0_i32 = arith.constant 0 : i32
    %c0_i32_0 = arith.constant 0 : i32
    %c0_i32_1 = arith.constant 0 : i32
    %c0_i32_2 = arith.constant 0 : i32
    %c0_i32_3 = arith.constant 0 : i32
    return %arg0, %c0_i32, %c0_i32_0, %c0_i32_1, %c0_i32_2 : i32, i32, i32, i32, i32
  }
}

</mosaic_0001>

<bundles_post_ra>
// kernel: tpu_custom_call.1
= control target key start
LH: loop header
LB: loop body
LE: loop exit
PB: predicated region body
PF: predicated region fallthrough
CT: control target
= control target key end

     0   :  { %7 = vsyncpa [#allocation5], 0  ;;  %s1950_s0 = inlined_call_operand.hbm [shape: f32[2,8,8,8], index: 0, kind: input, shape index: {}]   ;;  %s1951_s1 = inlined_call_operand.vmem [shape: f32[72,16], index: 1, kind: input, shape index: {}]   ;;  %s1952_s2 = inlined_call_operand.hbm [shape: f32[2,8,2,8,8], index: 2, kind: output, shape index: {}]  }
   0x1   :  { %8 = vsyncpa [#allocation6], 0  ;;  %s13_s11 = sshll.u32 %s1950_s0, 4  ;;  %s1275_s12 = smov [#allocation4]   ;;  %s14_s11 = int_to_ptr.hbm [resolvable:$true] %s13_s11 }
   0x2   :  { %s15_s13 = sshll.u32 %s1275_s12, 4  ;;  %s1276_s14 = smov 128   ;;  %s16_s13 = int_to_ptr.vmem [resolvable:$true] %s15_s13 }
   0x3   :  { %s1277_s15 = smov 8  }
   0x4   :  { %21 = dma.hbm_to_vmem [thread:$0]  %s14_s11, 2048, %s16_s13, [#allocation5], %s1276_s14, %s1276_s14, %s1277_s15  }
   0x5   :  { %1271 = dma.done.wait [#allocation5], 2048  }
   0x6   :  { %1272 = vsyncadd [#allocation5], 4294965248  ;;  %vm28_vm0 = vcmask 64512   ;;  %vm30_vm1 = vcmask 58368   ;;  %v1278_v0 = vmov 0.0   ;;  %v71_v2 = vld [vmem:[#allocation4 + $0x8] sm:$0xff] }
   0x7   :  { %29 = vst.msk [vmem:[#allocation2] sm:$0xff] %vm28_vm0, %v1278_v0  ;;  %v70_v3 = vld [vmem:[#allocation4] sm:$0xff]  ;;  %v72_v4 = vld [vmem:[#allocation4 + $0x10] sm:$0xff]  ;;  %v75_v5 = vld [vmem:[#allocation4 + $0x28] sm:$0xff]  ;;  %s1279_s0 = smov 16   ;;  %vm215_vm2 = vcmask 130112  }
   0x8   :  { %31 = vst.msk [vmem:[#allocation2 + $0x8] sm:$0x3] %vm30_vm1, %v1278_v0  ;;  %v76_v6 = vld [vmem:[#allocation4 + $0x30] sm:$0xff]  ;;  %v78_v8 = vld [vmem:[#allocation4 + $0x40] sm:$0xff]  ;;  %v79_v9 = vld [vmem:[#allocation4 + $0x48] sm:$0xff]  ;;  %s1280_s16 = smov 24  }
   0x9   :  { %32 = vst.msk [vmem:[#allocation2 + $0x10] sm:$0xff] %vm28_vm0, %v1278_v0  ;;  %v81_v10 = vld [vmem:[#allocation4 + $0x58] sm:$0xff]  ;;  %v82_v11 = vld [vmem:[#allocation4 + $0x60] sm:$0xff]  ;;  %v84_v12 = vld [vmem:[#allocation4 + $0x70] sm:$0xff]  ;;  %s1281_s17 = smov 32   ;;  %vm312_vm3 = vcmask 195712  }
   0xa   :  { %33 = vst.msk [vmem:[#allocation2 + $0x18] sm:$0x3] %vm30_vm1, %v1278_v0  ;;  %v73_v14 = vld [vmem:[#allocation4 + $0x18] sm:$0xff]  ;;  %v74_v18 = vld [vmem:[#allocation4 + $0x20] sm:$0xff]  ;;  %v80_v22 = vld [vmem:[#allocation4 + $0x50] sm:$0xff]  ;;  %s1282_s18 = smov 40  }
   0xb   :  { %34 = vst.msk [vmem:[#allocation2 + $0x20] sm:$0xff] %vm28_vm0, %v1278_v0  ;;  %v83_v26 = vld [vmem:[#allocation4 + $0x68] sm:$0xff]  ;;  %v77_v42 = vld [vmem:[#allocation4 + $0x38] sm:$0xff]  ;;  %s1283_s19 = smov 48   ;;  %s1284_s20 = smov 56   ;;  %vm409_vm4 = vcmask 261312  }
   0xc   :  { %35 = vst.msk [vmem:[#allocation2 + $0x28] sm:$0x3] %vm30_vm1, %v1278_v0  ;;  %s1285_s21 = smov 64   ;;  %vm506_vm5 = vcmask 326912   ;;  %vm603_vm6 = vcmask 392512   ;;  %vm701_vm7 = vcmask 458112  }
   0xd   :  { %36 = vst.msk [vmem:[#allocation2 + $0x30] sm:$0xff] %vm28_vm0, %v1278_v0  ;;  %vm895_vm8 = vcmask 589312   ;;  %vm798_vm9 = vcmask 523712   ;;  %vm937_vm10 = vcmask 588800   ;;  %s1287_s12 = smov [#allocation7]  }
   0xe   :  { %37 = vst.msk [vmem:[#allocation2 + $0x38] sm:$0x3] %vm30_vm1, %v1278_v0  ;;  %v103_v53 = vld [vmem:[#allocation2] sm:$0xff]  ;;  %s1152_s13 = sshll.u32 %s1287_s12, 4  ;;  %s1153_s13 = int_to_ptr.vmem [resolvable:$true] %s1152_s13 }
   0xf   :  { %v135_v1 = vld [vmem:[#allocation2 + $0x1] sm:$0xff]  ;;  %38 = vst.msk [vmem:[#allocation2 + $0x40] sm:$0xff] %vm28_vm0, %v1278_v0 }
  0x10   :  { %167 = vrot.lane.b32.xlu0 %v135_v1, %s1277_s15  ;;  %39 = vst.msk [vmem:[#allocation2 + $0x48] sm:$0x3] %vm30_vm1, %v1278_v0  ;;  %v232_v31 = vld [vmem:[#allocation2 + $0x2] sm:$0xff] }
  0x11   :  { %40 = vst.msk [vmem:[#allocation2 + $0x50] sm:$0xff] %vm28_vm0, %v1278_v0 }
  0x12   :  { %41 = vst.msk [vmem:[#allocation2 + $0x58] sm:$0x3] %vm30_vm1, %v1278_v0 }
  0x13   :  { %42 = vst.msk [vmem:[#allocation2 + $0x60] sm:$0xff] %vm28_vm0, %v1278_v0 }
  0x14   :  { %43 = vst.msk [vmem:[#allocation2 + $0x68] sm:$0x3] %vm30_vm1, %v1278_v0 }
  0x15   :  { %44 = vst.msk [vmem:[#allocation2 + $0x70] sm:$0xff] %vm28_vm0, %v1278_v0 }
  0x16   :  { %45 = vst.msk [vmem:[#allocation2 + $0x78] sm:$0x3] %vm30_vm1, %v1278_v0 }
  0x17   :  { %46 = vst.msk [vmem:[#allocation2 + $0x80] sm:$0xff] %vm28_vm0, %v1278_v0 }
  0x18   :  { %47 = vst.msk [vmem:[#allocation2 + $0x88] sm:$0x3] %vm30_vm1, %v1278_v0 }
  0x19   :  { %48 = vst.msk [vmem:[#allocation2 + $0x90] sm:$0xff] %vm28_vm0, %v1278_v0 }
  0x1a   :  { %49 = vst.msk [vmem:[#allocation2 + $0x98] sm:$0x3] %vm30_vm1, %v1278_v0 }
  0x1b   :  { %50 = vst.msk [vmem:[#allocation2 + $0xa0] sm:$0xff] %vm28_vm0, %v1278_v0 }
  0x1c   :  { %51 = vst.msk [vmem:[#allocation2 + $0xa8] sm:$0x3] %vm30_vm1, %v1278_v0 }
  0x1d   :  { %52 = vst.msk [vmem:[#allocation2 + $0xb0] sm:$0xff] %vm28_vm0, %v1278_v0 }
  0x1e   :  { %53 = vst.msk [vmem:[#allocation2 + $0xb8] sm:$0x3] %vm30_vm1, %v1278_v0 }
  0x1f   :  { %54 = vst.msk [vmem:[#allocation2 + $0xc0] sm:$0xff] %vm28_vm0, %v1278_v0 }
  0x20   :  { %55 = vst.msk [vmem:[#allocation2 + $0xc8] sm:$0x3] %vm30_vm1, %v1278_v0 }
  0x21   :  { %56 = vst.msk [vmem:[#allocation2 + $0xd0] sm:$0xff] %vm28_vm0, %v1278_v0 }
  0x22   :  { %57 = vst.msk [vmem:[#allocation2 + $0xd8] sm:$0x3] %vm30_vm1, %v1278_v0  ;;  %v111_v62 = vld [vmem:[#allocation2 + $0xa0] sm:$0xff] }
  0x23   :  { %58 = vst.msk [vmem:[#allocation2 + $0xe0] sm:$0xff] %vm28_vm0, %v1278_v0  ;;  %v143_v7 = vld [vmem:[#allocation2 + $0xa1] sm:$0xff] }
  0x24   :  { %59 = vst.msk [vmem:[#allocation2 + $0xe8] sm:$0x3] %vm30_vm1, %v1278_v0  ;;  %183 = vrot.lane.b32.xlu2 %v143_v7, %s1277_s15  ;;  %v240_v40 = vld [vmem:[#allocation2 + $0xa2] sm:$0xff] }
  0x25   :  { %60 = vst.msk [vmem:[#allocation2 + $0xf0] sm:$0xff] %vm28_vm0, %v1278_v0 }
  0x26   :  { %61 = vst.msk [vmem:[#allocation2 + $0xf8] sm:$0x3] %vm30_vm1, %v1278_v0 }
  0x27   :  { %62 = vst.msk [vmem:[#allocation2 + $0x100] sm:$0xff] %vm28_vm0, %v1278_v0 }
  0x28   :  { %63 = vst.msk [vmem:[#allocation2 + $0x108] sm:$0x3] %vm30_vm1, %v1278_v0 }
  0x29   :  { %64 = vst.msk [vmem:[#allocation2 + $0x110] sm:$0xff] %vm28_vm0, %v1278_v0 }
  0x2a   :  { %65 = vst.msk [vmem:[#allocation2 + $0x118] sm:$0x3] %vm30_vm1, %v1278_v0 }
  0x2b   :  { %66 = vst.msk [vmem:[#allocation2 + $0x120] sm:$0xff] %vm28_vm0, %v1278_v0 }
  0x2c   :  { %67 = vst.msk [vmem:[#allocation2 + $0x128] sm:$0x3] %vm30_vm1, %v1278_v0 }
  0x2d   :  { %68 = vst.msk [vmem:[#allocation2 + $0x130] sm:$0xff] %vm28_vm0, %v1278_v0 }
  0x2e   :  { %69 = vst.msk [vmem:[#allocation2 + $0x138] sm:$0x3] %vm30_vm1, %v1278_v0 }
  0x2f   :  { %88 = vst.msk [vmem:[#allocation2 + $0x21] sm:$0xff] %vm28_vm0, %v71_v2 }
  0x30   :  { %87 = vst.msk [vmem:[#allocation2 + $0x11] sm:$0xff] %vm28_vm0, %v70_v3 }
  0x31   :  { %89 = vst.msk [vmem:[#allocation2 + $0x31] sm:$0xff] %vm28_vm0, %v72_v4 }
  0x32   :  { %92 = vst.msk [vmem:[#allocation2 + $0x61] sm:$0xff] %vm28_vm0, %v75_v5  ;;  %v85_v5 = vld [vmem:[#allocation4 + $0x78] sm:$0xff] }
  0x33   :  { %93 = vst.msk [vmem:[#allocation2 + $0x71] sm:$0xff] %vm28_vm0, %v76_v6 }
  0x34   :  { %95 = vst.msk [vmem:[#allocation2 + $0xb1] sm:$0xff] %vm28_vm0, %v78_v8 }
  0x35   :  { %96 = vst.msk [vmem:[#allocation2 + $0xc1] sm:$0xff] %vm28_vm0, %v79_v9 }
  0x36   :  { %v1358_v13 = vld [vmem:[#allocation2 + $0x21] sm:$0xff]  ;;  %98 = vst.msk [vmem:[#allocation2 + $0xe1] sm:$0xff] %vm28_vm0, %v81_v10 }
  0x37   :  { %171 = vrot.lane.b32.xlu1 %v1358_v13, %s1277_s15  ;;  %v1363_v15 = vld [vmem:[#allocation2 + $0x11] sm:$0xff]  ;;  %99 = vst.msk [vmem:[#allocation2 + $0xf1] sm:$0xff] %vm28_vm0, %v82_v11  ;;  %v1421_v32 = vld [vmem:[#allocation2 + $0x22] sm:$0xff] }
  0x38   :  { %169 = vrot.lane.b32.xlu0 %v1363_v15, %s1277_s15  ;;  %101 = vst.msk [vmem:[#allocation2 + $0x111] sm:$0xff] %vm28_vm0, %v84_v12  ;;  %v1370_v16 = vld [vmem:[#allocation2 + $0x31] sm:$0xff]  ;;  %v1438_v37 = vld [vmem:[#allocation2 + $0x20] sm:$0xff] }
  0x39   :  { %90 = vst.msk [vmem:[#allocation2 + $0x41] sm:$0xff] %vm28_vm0, %v73_v14  ;;  %v1372_v17 = vld [vmem:[#allocation2 + $0x61] sm:$0xff]  ;;  %v1423_v33 = vld [vmem:[#allocation2 + $0x12] sm:$0xff] }
  0x3a   :  { %91 = vst.msk [vmem:[#allocation2 + $0x51] sm:$0xff] %vm28_vm0, %v74_v18  ;;  %v1383_v20 = vld [vmem:[#allocation2 + $0x71] sm:$0xff]  ;;  %v1450_v39 = vld [vmem:[#allocation2 + $0x62] sm:$0xff] }
  0x3b   :  { %v1385_v21 = vld [vmem:[#allocation2 + $0xb1] sm:$0xff]  ;;  %97 = vst.msk [vmem:[#allocation2 + $0xd1] sm:$0xff] %vm28_vm0, %v80_v22  ;;  %v1457_v43 = vld [vmem:[#allocation2 + $0x60] sm:$0xff] }
  0x3c   :  { %v1396_v24 = vld [vmem:[#allocation2 + $0xc1] sm:$0xff]  ;;  %100 = vst.msk [vmem:[#allocation2 + $0x101] sm:$0xff] %vm28_vm0, %v83_v26  ;;  %v1430_v34 = vld [vmem:[#allocation2 + $0x32] sm:$0xff] }
  0x3d   :  { %v1398_v25 = vld [vmem:[#allocation2 + $0xe1] sm:$0xff]  ;;  %v1442_v38 = vld [vmem:[#allocation2 + $0x30] sm:$0xff]  ;;  %121 = vst.msk [vmem:[#allocation3 + $0x10] sm:$0xff] %vm28_vm0, %v1438_v37 }
  0x3e   :  { %v1409_v28 = vld [vmem:[#allocation2 + $0xf1] sm:$0xff]  ;;  %122 = vst.msk [vmem:[#allocation3 + $0x18] sm:$0xff] %vm28_vm0, %v1442_v38  ;;  %v1472_v47 = vld [vmem:[#allocation2 + $0xc2] sm:$0xff] }
  0x3f   :  { %173 = vrot.lane.b32.xlu1 %v1370_v16, %s1277_s15  ;;  %v1411_v29 = vld [vmem:[#allocation2 + $0x111] sm:$0xff]  ;;  %94 = vst.msk [vmem:[#allocation2 + $0x81] sm:$0xff] %vm28_vm0, %v77_v42  ;;  %v1481_v49 = vld [vmem:[#allocation2 + $0xe2] sm:$0xff] }
  0x40   :  { %179 = vrot.lane.b32.xlu0 %v1372_v17, %s1277_s15  ;;  %v1379_v19 = vld [vmem:[#allocation2 + $0x41] sm:$0xff]  ;;  %v1452_v41 = vld [vmem:[#allocation2 + $0x72] sm:$0xff]  ;;  %125 = vst.msk [vmem:[#allocation3 + $0x30] sm:$0xff] %vm28_vm0, %v1457_v43 }
  0x41   :  { %175 = vrot.lane.b32.xlu2 %v1379_v19, %s1277_s15  ;;  %v1387_v23 = vld [vmem:[#allocation2 + $0x51] sm:$0xff]  ;;  %v1434_v36 = vld [vmem:[#allocation2 + $0x42] sm:$0xff]  ;;  %119 = vst.msk [vmem:[#allocation3] sm:$0xff] %vm28_vm0, %v103_v53 }
  0x42   :  { %v1400_v27 = vld [vmem:[#allocation2 + $0xd1] sm:$0xff]  ;;  %v1500_v56 = vld [vmem:[#allocation2 + $0xe0] sm:$0xff]  ;;  %127 = vst.msk [vmem:[#allocation3 + $0x40] sm:$0xff] %vm28_vm0, %v111_v62 }
  0x43   :  { %v1413_v30 = vld [vmem:[#allocation2 + $0x101] sm:$0xff]  ;;  %v1432_v35 = vld [vmem:[#allocation2 + $0x52] sm:$0xff]  ;;  %131 = vst.msk [vmem:[#allocation3 + $0x60] sm:$0xff] %vm28_vm0, %v1500_v56 }
  0x44   :  { %v1462_v44 = vld [vmem:[#allocation2 + $0x50] sm:$0xff]  ;;  %v1483_v50 = vld [vmem:[#allocation2 + $0x102] sm:$0xff]  ;;  %102 = vst.msk [vmem:[#allocation2 + $0x121] sm:$0xff] %vm28_vm0, %v85_v5 }
  0x45   :  { %124 = vst.msk [vmem:[#allocation3 + $0x28] sm:$0xff] %vm28_vm0, %v1462_v44  ;;  %v1468_v45 = vld [vmem:[#allocation2 + $0xb2] sm:$0xff]  ;;  %v1508_v58 = vld [vmem:[#allocation2 + $0x100] sm:$0xff] }
  0x46   :  { %v1470_v46 = vld [vmem:[#allocation2 + $0xd2] sm:$0xff]  ;;  %133 = vst.msk [vmem:[#allocation3 + $0x70] sm:$0xff] %vm28_vm0, %v1508_v58  ;;  %v1515_v59 = vld [vmem:[#allocation2 + $0x40] sm:$0xff] }
  0x47   :  { %181 = vrot.lane.b32.xlu1 %v1383_v20, %s1277_s15  ;;  %v337_v48 = vld [vmem:[#allocation2 + $0xb0] sm:$0xff]  ;;  %123 = vst.msk [vmem:[#allocation3 + $0x20] sm:$0xff] %vm28_vm0, %v1515_v59  ;;  %v1535_v0 = vld [vmem:[#allocation2 + $0x80] sm:$0xff] }
  0x48   :  { %185 = vrot.lane.b32.xlu0 %v1385_v21, %s1277_s15  ;;  %128 = vst.msk [vmem:[#allocation3 + $0x48] sm:$0xff] %vm28_vm0, %v337_v48  ;;  %v1485_v51 = vld [vmem:[#allocation2 + $0xf2] sm:$0xff]  ;;  %v1544_v2 = vld [vmem:[#allocation2 + $0xc0] sm:$0xff] }
  0x49   :  { %177 = vrot.lane.b32.xlu2 %v1387_v23, %s1277_s15  ;;  %v1489_v52 = vld [vmem:[#allocation2 + $0xd0] sm:$0xff]  ;;  %129 = vst.msk [vmem:[#allocation3 + $0x50] sm:$0xff] %vm28_vm0, %v1544_v2 }
  0x4a   :  { %130 = vst.msk [vmem:[#allocation3 + $0x58] sm:$0xff] %vm28_vm0, %v1489_v52  ;;  %v329_v54 = vld [vmem:[#allocation2 + $0x10] sm:$0xff] }
  0x4b   :  { %120 = vst.msk [vmem:[#allocation3 + $0x8] sm:$0xff] %vm28_vm0, %v329_v54  ;;  %v1502_v57 = vld [vmem:[#allocation2 + $0x112] sm:$0xff]  ;;  %v1568_v9 = vld [vmem:[#allocation2 + $0x120] sm:$0xff] }
  0x4c   :  { %v1517_v60 = vld [vmem:[#allocation2 + $0x110] sm:$0xff] }
  0x4d   :  { %134 = vst.msk [vmem:[#allocation3 + $0x78] sm:$0xff] %vm28_vm0, %v1517_v60  ;;  %v1531_v63 = vld [vmem:[#allocation2 + $0x70] sm:$0xff] }
  0x4e   :  { %126 = vst.msk [vmem:[#allocation3 + $0x38] sm:$0xff] %vm28_vm0, %v1531_v63  ;;  %v1554_v4 = vld [vmem:[#allocation2 + $0xf0] sm:$0xff] }
  0x4f   :  { %187 = vrot.lane.b32.xlu1 %v1396_v24, %s1277_s15  ;;  %132 = vst.msk [vmem:[#allocation3 + $0x68] sm:$0xff] %vm28_vm0, %v1554_v4 }
  0x50   :  { %191 = vrot.lane.b32.xlu0 %v1398_v25, %s1277_s15 }
  0x51   :  { %189 = vrot.lane.b32.xlu2 %v1400_v27, %s1277_s15 }
  0x57   :  { %193 = vrot.lane.b32.xlu1 %v1409_v28, %s1277_s15 }
  0x58   :  { %197 = vrot.lane.b32.xlu0 %v1411_v29, %s1277_s15 }
  0x59   :  { %195 = vrot.lane.b32.xlu2 %v1413_v30, %s1277_s15 }
  0x5f   :  { %264 = vrot.lane.b32.xlu1 %v232_v31, %s1279_s0 }
  0x60   :  { %268 = vrot.lane.b32.xlu0 %v1421_v32, %s1279_s0 }
  0x61   :  { %266 = vrot.lane.b32.xlu2 %v1423_v33, %s1279_s0 }
  0x67   :  { %270 = vrot.lane.b32.xlu1 %v1430_v34, %s1279_s0 }
  0x68   :  { %274 = vrot.lane.b32.xlu0 %v1432_v35, %s1279_s0 }
  0x69   :  { %272 = vrot.lane.b32.xlu2 %v1434_v36, %s1279_s0 }
  0x6f   :  { %276 = vrot.lane.b32.xlu1 %v1450_v39, %s1279_s0 }
  0x70   :  { %280 = vrot.lane.b32.xlu0 %v240_v40, %s1279_s0  ;;  %v1596_v40 = vld [vmem:[#allocation2 + $0x81] sm:$0xff] }
  0x71   :  { %278 = vrot.lane.b32.xlu2 %v1452_v41, %s1279_s0 }
  0x77   :  { %282 = vrot.lane.b32.xlu1 %v1468_v45, %s1279_s0 }
  0x78   :  { %286 = vrot.lane.b32.xlu0 %v1470_v46, %s1279_s0 }
  0x79   :  { %284 = vrot.lane.b32.xlu2 %v1472_v47, %s1279_s0 }
  0x7e   :  { %v184_v61 = vpop.permute.xlu2 %183 }
  0x7f   :  { %288 = vrot.lane.b32.xlu1 %v1481_v49, %s1279_s0  ;;  %224 = vst.msk [vmem:[#allocation3 + $0x40] sm:$0xff] %vm215_vm2, %v184_v61 }
  0x80   :  { %292 = vrot.lane.b32.xlu0 %v1483_v50, %s1279_s0 }
  0x81   :  { %290 = vrot.lane.b32.xlu2 %v1485_v51, %s1279_s0 }
  0x82   :  { %v168_v55 = vpop.permute.xlu0 %167 }
  0x83   :  { %216 = vst.msk [vmem:[#allocation3] sm:$0xff] %vm215_vm2, %v168_v55 }
  0x87   :  { %294 = vrot.lane.b32.xlu1 %v1502_v57, %s1279_s0 }
  0x88   :  { %363 = vrot.lane.b32.xlu0 %v1438_v37, %s1280_s16 }
  0x89   :  { %361 = vrot.lane.b32.xlu2 %v329_v54, %s1280_s16 }
  0x8f   :  { %365 = vrot.lane.b32.xlu1 %v1442_v38, %s1280_s16 }
  0x90   :  { %369 = vrot.lane.b32.xlu0 %v1462_v44, %s1280_s16 }
  0x91   :  { %367 = vrot.lane.b32.xlu2 %v1515_v59, %s1280_s16 }
  0x97   :  { %371 = vrot.lane.b32.xlu1 %v1457_v43, %s1280_s16 }
  0x98   :  { %375 = vrot.lane.b32.xlu0 %v1535_v0, %s1280_s16 }
  0x99   :  { %373 = vrot.lane.b32.xlu2 %v1531_v63, %s1280_s16 }
  0x9b   :  { %v176_v1 = vpop.permute.xlu2 %175 }
  0x9c   :  { %220 = vst.msk [vmem:[#allocation3 + $0x20] sm:$0xff] %vm215_vm2, %v176_v1 }
  0x9f   :  { %377 = vrot.lane.b32.xlu1 %v337_v48, %s1280_s16 }
  0xa0   :  { %381 = vrot.lane.b32.xlu0 %v1489_v52, %s1280_s16 }
  0xa1   :  { %379 = vrot.lane.b32.xlu2 %v1544_v2, %s1280_s16 }
  0xa3   :  { %v178_v3 = vpop.permute.xlu2 %177 }
  0xa4   :  { %221 = vst.msk [vmem:[#allocation3 + $0x28] sm:$0xff] %vm215_vm2, %v178_v3 }
  0xa7   :  { %383 = vrot.lane.b32.xlu1 %v1500_v56, %s1280_s16 }
  0xa8   :  { %387 = vrot.lane.b32.xlu0 %v1508_v58, %s1280_s16 }
  0xa9   :  { %v172_v6 = vpop.permute.xlu1 %171  ;;  %385 = vrot.lane.b32.xlu2 %v1554_v4, %s1280_s16 }
  0xaa   :  { %218 = vst.msk [vmem:[#allocation3 + $0x10] sm:$0xff] %vm215_vm2, %v172_v6  ;;  %v170_v7 = vpop.permute.xlu0 %169 }
  0xab   :  { %217 = vst.msk [vmem:[#allocation3 + $0x8] sm:$0xff] %vm215_vm2, %v170_v7  ;;  %v190_v8 = vpop.permute.xlu2 %189 }
  0xac   :  { %227 = vst.msk [vmem:[#allocation3 + $0x58] sm:$0xff] %vm215_vm2, %v190_v8 }
  0xaf   :  { %389 = vrot.lane.b32.xlu1 %v1517_v60, %s1280_s16 }
  0xb0   :  { %458 = vrot.lane.b32.xlu0 %v1363_v15, %s1281_s17 }
  0xb1   :  { %v174_v10 = vpop.permute.xlu1 %173  ;;  %391 = vrot.lane.b32.xlu2 %v1568_v9, %s1280_s16 }
  0xb2   :  { %219 = vst.msk [vmem:[#allocation3 + $0x18] sm:$0xff] %vm215_vm2, %v174_v10  ;;  %v180_v11 = vpop.permute.xlu0 %179 }
  0xb3   :  { %222 = vst.msk [vmem:[#allocation3 + $0x30] sm:$0xff] %vm215_vm2, %v180_v11  ;;  %v196_v12 = vpop.permute.xlu2 %195 }
  0xb4   :  { %230 = vst.msk [vmem:[#allocation3 + $0x70] sm:$0xff] %vm215_vm2, %v196_v12 }
  0xb7   :  { %460 = vrot.lane.b32.xlu1 %v1358_v13, %s1281_s17 }
  0xb8   :  { %464 = vrot.lane.b32.xlu0 %v1379_v19, %s1281_s17 }
  0xb9   :  { %v182_v14 = vpop.permute.xlu1 %181  ;;  %462 = vrot.lane.b32.xlu2 %v1370_v16, %s1281_s17 }
  0xba   :  { %223 = vst.msk [vmem:[#allocation3 + $0x38] sm:$0xff] %vm215_vm2, %v182_v14  ;;  %v186_v15 = vpop.permute.xlu0 %185 }
  0xbb   :  { %225 = vst.msk [vmem:[#allocation3 + $0x48] sm:$0xff] %vm215_vm2, %v186_v15  ;;  %v267_v18 = vpop.permute.xlu2 %266 }
  0xbc   :  { %314 = vst.msk [vmem:[#allocation3 + $0x8] sm:$0xff] %vm312_vm3, %v267_v18 }
  0xbf   :  { %466 = vrot.lane.b32.xlu1 %v1387_v23, %s1281_s17 }
  0xc0   :  { %470 = vrot.lane.b32.xlu0 %v1383_v20, %s1281_s17 }
  0xc1   :  { %v188_v22 = vpop.permute.xlu1 %187  ;;  %468 = vrot.lane.b32.xlu2 %v1372_v17, %s1281_s17 }
  0xc2   :  { %226 = vst.msk [vmem:[#allocation3 + $0x50] sm:$0xff] %vm215_vm2, %v188_v22  ;;  %v192_v26 = vpop.permute.xlu0 %191 }
  0xc3   :  { %228 = vst.msk [vmem:[#allocation3 + $0x60] sm:$0xff] %vm215_vm2, %v192_v26  ;;  %v273_v31 = vpop.permute.xlu2 %272  ;;  %v933_v26 = vld [vmem:[%s1951_s1 + $0x28] sm:$0xff] }
  0xc4   :  { %317 = vst.msk [vmem:[#allocation3 + $0x20] sm:$0xff] %vm312_vm3, %v273_v31  ;;  %v732_v31 = vld [vmem:[#allocation2 + $0x121] sm:$0xff] }
  0xc7   :  { %472 = vrot.lane.b32.xlu1 %v1596_v40, %s1281_s17 }
  0xc8   :  { %476 = vrot.lane.b32.xlu0 %v1396_v24, %s1281_s17 }
  0xc9   :  { %v194_v42 = vpop.permute.xlu1 %193  ;;  %474 = vrot.lane.b32.xlu2 %v1385_v21, %s1281_s17 }
  0xca   :  { %229 = vst.msk [vmem:[#allocation3 + $0x68] sm:$0xff] %vm215_vm2, %v194_v42  ;;  %v198_v48 = vpop.permute.xlu0 %197  ;;  %v1745_v42 = vld [vmem:[#allocation2 + $0x122] sm:$0xff] }
  0xcb   :  { %231 = vst.msk [vmem:[#allocation3 + $0x78] sm:$0xff] %vm215_vm2, %v198_v48  ;;  %v279_v53 = vpop.permute.xlu2 %278  ;;  %v932_v48 = vld [vmem:[%s1951_s1 + $0x20] sm:$0xff] }
  0xcc   :  { %320 = vst.msk [vmem:[#allocation3 + $0x38] sm:$0xff] %vm312_vm3, %v279_v53 }
  0xcf   :  { %478 = vrot.lane.b32.xlu1 %v1400_v27, %s1281_s17 }
  0xd0   :  { %482 = vrot.lane.b32.xlu0 %v1409_v28, %s1281_s17 }
  0xd1   :  { %v265_v54 = vpop.permute.xlu1 %264  ;;  %480 = vrot.lane.b32.xlu2 %v1398_v25, %s1281_s17 }
  0xd2   :  { %313 = vst.msk [vmem:[#allocation3] sm:$0xff] %vm312_vm3, %v265_v54  ;;  %v269_v21 = vpop.permute.xlu0 %268  ;;  %v931_v54 = vld [vmem:[%s1951_s1 + $0x18] sm:$0xff] }
  0xd3   :  { %315 = vst.msk [vmem:[#allocation3 + $0x10] sm:$0xff] %vm312_vm3, %v269_v21  ;;  %v285_v55 = vpop.permute.xlu2 %284 }
  0xd4   :  { %323 = vst.msk [vmem:[#allocation3 + $0x50] sm:$0xff] %vm312_vm3, %v285_v55 }
  0xd7   :  { %484 = vrot.lane.b32.xlu1 %v1413_v30, %s1281_s17 }
  0xd8   :  { %579 = vrot.lane.b32.xlu0 %v1485_v51, %s1282_s18 }
  0xd9   :  { %v271_v61 = vpop.permute.xlu1 %270  ;;  %571 = vrot.lane.b32.xlu2 %v1468_v45, %s1282_s18 }
  0xda   :  { %316 = vst.msk [vmem:[#allocation3 + $0x18] sm:$0xff] %vm312_vm3, %v271_v61  ;;  %v275_v62 = vpop.permute.xlu0 %274  ;;  %v930_v61 = vld [vmem:[%s1951_s1 + $0x10] sm:$0xff] }
  0xdb   :  { %318 = vst.msk [vmem:[#allocation3 + $0x28] sm:$0xff] %vm312_vm3, %v275_v62  ;;  %v291_v1 = vpop.permute.xlu2 %290  ;;  %v929_v62 = vld [vmem:[%s1951_s1 + $0x8] sm:$0xff] }
  0xdc   :  { %326 = vst.msk [vmem:[#allocation3 + $0x68] sm:$0xff] %vm312_vm3, %v291_v1  ;;  %v928_v1 = vld [vmem:[%s1951_s1] sm:$0xff] }
  0xdf   :  { %669 = vrot.lane.b32.xlu1 %v1544_v2, %s1283_s19 }
  0xe0   :  { %766 = vrot.lane.b32.xlu0 %v1396_v24, %s1284_s20 }
  0xe1   :  { %v277_v3 = vpop.permute.xlu1 %276  ;;  %677 = vrot.lane.b32.xlu2 %v1508_v58, %s1283_s19 }
  0xe2   :  { %319 = vst.msk [vmem:[#allocation3 + $0x30] sm:$0xff] %vm312_vm3, %v277_v3  ;;  %v281_v45 = vpop.permute.xlu0 %280 }
  0xe3   :  { %321 = vst.msk [vmem:[#allocation3 + $0x40] sm:$0xff] %vm312_vm3, %v281_v45  ;;  %v362_v5 = vpop.permute.xlu2 %361 }
  0xe4   :  { %410 = vst.msk [vmem:[#allocation3] sm:$0xff] %vm409_vm4, %v362_v5 }
  0xe7   :  { %774 = vrot.lane.b32.xlu1 %v1413_v30, %s1284_s20 }
  0xe8   :  { %871 = vrot.lane.b32.xlu0 %v1483_v50, %s1285_s21 }
  0xe9   :  { %v283_v24 = vpop.permute.xlu1 %282  ;;  %863 = vrot.lane.b32.xlu2 %v1472_v47, %s1285_s21 }
  0xea   :  { %322 = vst.msk [vmem:[#allocation3 + $0x48] sm:$0xff] %vm312_vm3, %v283_v24  ;;  %v287_v58 = vpop.permute.xlu0 %286 }
  0xeb   :  { %324 = vst.msk [vmem:[#allocation3 + $0x58] sm:$0xff] %vm312_vm3, %v287_v58  ;;  %v368_v2 = vpop.permute.xlu2 %367 }
  0xec   :  { %413 = vst.msk [vmem:[#allocation3 + $0x18] sm:$0xff] %vm409_vm4, %v368_v2  ;;  %v636_v2 = vld [vmem:[#allocation2 + $0x130] sm:$0xff] }
  0xef   :  { %555 = vrot.lane.b32.xlu1 %v1423_v33, %s1282_s18 }
  0xf0   :  { %653 = vrot.lane.b32.xlu0 %v1438_v37, %s1283_s19 }
  0xf1   :  { %v289_v30 = vpop.permute.xlu1 %288  ;;  %563 = vrot.lane.b32.xlu2 %v1432_v35, %s1282_s18 }
  0xf2   :  { %325 = vst.msk [vmem:[#allocation3 + $0x60] sm:$0xff] %vm312_vm3, %v289_v30  ;;  %v293_v6 = vpop.permute.xlu0 %292 }
  0xf3   :  { %327 = vst.msk [vmem:[#allocation3 + $0x70] sm:$0xff] %vm312_vm3, %v293_v6  ;;  %v374_v7 = vpop.permute.xlu2 %373 }
  0xf4   :  { %416 = vst.msk [vmem:[#allocation3 + $0x30] sm:$0xff] %vm409_vm4, %v374_v7  ;;  %v821_v7 = vld [vmem:[#allocation2 + $0x82] sm:$0xff] }
  0xf7   :  { %661 = vrot.lane.b32.xlu1 %v1457_v43, %s1283_s19 }
  0xf8   :  { %581 = vrot.lane.b32.xlu0 %v1483_v50, %s1282_s18 }
  0xf9   :  { %v295_v33 = vpop.permute.xlu1 %294  ;;  %573 = vrot.lane.b32.xlu2 %v1472_v47, %s1282_s18 }
  0xfa   :  { %328 = vst.msk [vmem:[#allocation3 + $0x78] sm:$0xff] %vm312_vm3, %v295_v33  ;;  %v364_v37 = vpop.permute.xlu0 %363  ;;  %v733_v33 = vld [vmem:[#allocation2 + $0x131] sm:$0xff] }
  0xfb   :  { %411 = vst.msk [vmem:[#allocation3 + $0x8] sm:$0xff] %vm409_vm4, %v364_v37  ;;  %v380_v8 = vpop.permute.xlu2 %379 }
  0xfc   :  { %419 = vst.msk [vmem:[#allocation3 + $0x48] sm:$0xff] %vm409_vm4, %v380_v8 }
  0xff   :  { %750 = vrot.lane.b32.xlu1 %v1358_v13, %s1284_s20 }
 0x100   :  { %671 = vrot.lane.b32.xlu0 %v1489_v52, %s1283_s19 }
 0x101   :  { %v366_v43 = vpop.permute.xlu1 %365  ;;  %758 = vrot.lane.b32.xlu2 %v1372_v17, %s1284_s20 }
 0x102   :  { %412 = vst.msk [vmem:[#allocation3 + $0x10] sm:$0xff] %vm409_vm4, %v366_v43  ;;  %v370_v47 = vpop.permute.xlu0 %369  ;;  %v830_v43 = vld [vmem:[#allocation2 + $0x132] sm:$0xff] }
 0x103   :  { %414 = vst.msk [vmem:[#allocation3 + $0x20] sm:$0xff] %vm409_vm4, %v370_v47  ;;  %v386_v50 = vpop.permute.xlu2 %385 }
 0x104   :  { %422 = vst.msk [vmem:[#allocation3 + $0x60] sm:$0xff] %vm409_vm4, %v386_v50 }
 0x107   :  { %679 = vrot.lane.b32.xlu1 %v1517_v60, %s1283_s19 }
 0x108   :  { %855 = vrot.lane.b32.xlu0 %v1450_v39, %s1285_s21 }
 0x109   :  { %v372_v13 = vpop.permute.xlu1 %371  ;;  %847 = vrot.lane.b32.xlu2 %v1421_v32, %s1285_s21 }
 0x10a   :  { %415 = vst.msk [vmem:[#allocation3 + $0x28] sm:$0xff] %vm409_vm4, %v372_v13  ;;  %v376_v17 = vpop.permute.xlu0 %375  ;;  %v628_v13 = vld [vmem:[#allocation2 + $0x90] sm:$0xff] }
 0x10b   :  { %417 = vst.msk [vmem:[#allocation3 + $0x38] sm:$0xff] %vm409_vm4, %v376_v17  ;;  %v392_v52 = vpop.permute.xlu2 %391 }
 0x10c   :  { %425 = vst.msk [vmem:[#allocation3 + $0x78] sm:$0xff] %vm409_vm4, %v392_v52 }
 0x10f   :  { %768 = vrot.lane.b32.xlu1 %v1400_v27, %s1284_s20 }
 0x110   :  { %865 = vrot.lane.b32.xlu0 %v1470_v46, %s1285_s21 }
 0x111   :  { %v378_v60 = vpop.permute.xlu1 %377  ;;  %776 = vrot.lane.b32.xlu2 %v1411_v29, %s1284_s20 }
 0x112   :  { %418 = vst.msk [vmem:[#allocation3 + $0x40] sm:$0xff] %vm409_vm4, %v378_v60  ;;  %v382_v10 = vpop.permute.xlu0 %381  ;;  %v725_v60 = vld [vmem:[#allocation2 + $0x91] sm:$0xff] }
 0x113   :  { %420 = vst.msk [vmem:[#allocation3 + $0x50] sm:$0xff] %vm409_vm4, %v382_v10  ;;  %v463_v11 = vpop.permute.xlu2 %462 }
 0x114   :  { %509 = vst.msk [vmem:[#allocation3 + $0x10] sm:$0xff] %vm506_vm5, %v463_v11 }
 0x117   :  { %873 = vrot.lane.b32.xlu1 %v1502_v57, %s1285_s21 }
 0x118   :  { %565 = vrot.lane.b32.xlu0 %v1450_v39, %s1282_s18 }
 0x119   :  { %v384_v27 = vpop.permute.xlu1 %383  ;;  %557 = vrot.lane.b32.xlu2 %v1421_v32, %s1282_s18 }
 0x11a   :  { %421 = vst.msk [vmem:[#allocation3 + $0x58] sm:$0xff] %vm409_vm4, %v384_v27  ;;  %v388_v12 = vpop.permute.xlu0 %387 }
 0x11b   :  { %423 = vst.msk [vmem:[#allocation3 + $0x68] sm:$0xff] %vm409_vm4, %v388_v12  ;;  %v469_v14 = vpop.permute.xlu2 %468  ;;  %v822_v12 = vld [vmem:[#allocation2 + $0x92] sm:$0xff] }
 0x11c   :  { %512 = vst.msk [vmem:[#allocation3 + $0x28] sm:$0xff] %vm506_vm5, %v469_v14 }
 0x11f   :  { %486 = vrot.lane.b32.xlu1 %v1411_v29, %s1281_s17 }
 0x120   :  { %663 = vrot.lane.b32.xlu0 %v1531_v63, %s1283_s19 }
 0x121   :  { %v390_v15 = vpop.permute.xlu1 %389  ;;  %655 = vrot.lane.b32.xlu2 %v1442_v38, %s1283_s19 }
 0x122   :  { %424 = vst.msk [vmem:[#allocation3 + $0x70] sm:$0xff] %vm409_vm4, %v390_v15  ;;  %v459_v32 = vpop.permute.xlu0 %458 }
 0x123   :  { %507 = vst.msk [vmem:[#allocation3] sm:$0xff] %vm506_vm5, %v459_v32  ;;  %v475_v39 = vpop.permute.xlu2 %474 }
 0x124   :  { %515 = vst.msk [vmem:[#allocation3 + $0x40] sm:$0xff] %vm506_vm5, %v475_v39 }
 0x127   :  { %575 = vrot.lane.b32.xlu1 %v1470_v46, %s1282_s18 }
 0x128   :  { %752 = vrot.lane.b32.xlu0 %v1370_v16, %s1284_s20 }
 0x129   :  { %v461_v29 = vpop.permute.xlu1 %460  ;;  %583 = vrot.lane.b32.xlu2 %v1502_v57, %s1282_s18 }
 0x12a   :  { %508 = vst.msk [vmem:[#allocation3 + $0x8] sm:$0xff] %vm506_vm5, %v461_v29  ;;  %v465_v38 = vpop.permute.xlu0 %464 }
 0x12b   :  { %510 = vst.msk [vmem:[#allocation3 + $0x18] sm:$0xff] %vm506_vm5, %v465_v38  ;;  %v481_v63 = vpop.permute.xlu2 %480 }
 0x12c   :  { %518 = vst.msk [vmem:[#allocation3 + $0x58] sm:$0xff] %vm506_vm5, %v481_v63 }
 0x12f   :  { %760 = vrot.lane.b32.xlu1 %v1383_v20, %s1284_s20  ;;  %v936_v20 = vld [vmem:[%s1951_s1 + $0x40] sm:$0xff] }
 0x130   :  { %681 = vrot.lane.b32.xlu0 %v1568_v9, %s1283_s19  ;;  %1184 = vmatpush.msra.mxu2 %v936_v20  ;;  %v935_v9 = vld [vmem:[%s1951_s1 + $0x38] sm:$0xff] }
 0x131   :  { %v467_v46 = vpop.permute.xlu1 %466  ;;  %673 = vrot.lane.b32.xlu2 %v1500_v56, %s1283_s19  ;;  %1185 = vmatpush.msra.mxu3 %v936_v20 }
 0x132   :  { %511 = vst.msk [vmem:[#allocation3 + $0x20] sm:$0xff] %vm506_vm5, %v467_v46  ;;  %v471_v16 = vpop.permute.xlu0 %470  ;;  %1187 = vmatpush.msra.mxu2 %v935_v9  ;;  %993 = vmatpush.msra.mxu0 %v936_v20 }
 0x133   :  { %513 = vst.msk [vmem:[#allocation3 + $0x30] sm:$0xff] %vm506_vm5, %v471_v16  ;;  %v572_v57 = vpop.permute.xlu2 %571  ;;  %1188 = vmatpush.msra.mxu3 %v935_v9  ;;  %1183 = vmatpush.msra.mxu1 %v936_v20 }
 0x134   :  { %612 = vst.msk [vmem:[#allocation3 + $0x40] sm:$0xff] %vm603_vm6, %v572_v57  ;;  %994 = vmatpush.msra.mxu0 %v935_v9 }
 0x135   :  { %1186 = vmatpush.msra.mxu1 %v935_v9 }
 0x137   :  { %849 = vrot.lane.b32.xlu1 %v1430_v34, %s1285_s21 }
 0x138   :  { %770 = vrot.lane.b32.xlu0 %v1398_v25, %s1284_s20  ;;  %v934_v25 = vld [vmem:[%s1951_s1 + $0x30] sm:$0xff]  ;;  %s1286_s1 = smov 120  }
 0x139   :  { %v473_v56 = vpop.permute.xlu1 %472  ;;  %857 = vrot.lane.b32.xlu2 %v1452_v41, %s1285_s21  ;;  %1190 = vmatpush.msra.mxu2 %v934_v25 }
 0x13a   :  { %514 = vst.msk [vmem:[#allocation3 + $0x38] sm:$0xff] %vm506_vm5, %v473_v56  ;;  %v477_v18 = vpop.permute.xlu0 %476  ;;  %1191 = vmatpush.msra.mxu3 %v934_v25  ;;  %995 = vmatpush.msra.mxu0 %v934_v25 }
 0x13b   :  { %516 = vst.msk [vmem:[#allocation3 + $0x48] sm:$0xff] %vm506_vm5, %v477_v18  ;;  %v678_v22 = vpop.permute.xlu2 %677  ;;  %1193 = vmatpush.msra.mxu2 %v933_v26  ;;  %1189 = vmatpush.msra.mxu1 %v934_v25 }
 0x13c   :  { %1194 = vmatpush.msra.mxu3 %v933_v26  ;;  %996 = vmatpush.msra.mxu0 %v933_v26 }
 0x13d   :  { %1196 = vmatpush.msra.mxu2 %v932_v48  ;;  %1192 = vmatpush.msra.mxu1 %v933_v26 }
 0x13e   :  { %1197 = vmatpush.msra.mxu3 %v932_v48  ;;  %997 = vmatpush.msra.mxu0 %v932_v48 }
 0x13f   :  { %778 = vrot.lane.b32.xlu1 %v732_v31, %s1284_s20  ;;  %1199 = vmatpush.msra.mxu2 %v931_v54 }
 0x140   :  { %875 = vrot.lane.b32.xlu0 %v1745_v42, %s1285_s21  ;;  %1200 = vmatpush.msra.mxu3 %v931_v54 }
 0x141   :  { %v479_v53 = vpop.permute.xlu1 %478  ;;  %867 = vrot.lane.b32.xlu2 %v1481_v49, %s1285_s21  ;;  %1202 = vmatpush.msra.mxu2 %v930_v61 }
 0x142   :  { %517 = vst.msk [vmem:[#allocation3 + $0x50] sm:$0xff] %vm506_vm5, %v479_v53  ;;  %v483_v21 = vpop.permute.xlu0 %482  ;;  %1203 = vmatpush.msra.mxu3 %v930_v61  ;;  %998 = vmatpush.msra.mxu0 %v931_v54 }
 0x143   :  { %519 = vst.msk [vmem:[#allocation3 + $0x60] sm:$0xff] %vm506_vm5, %v483_v21  ;;  %v864_v55 = vpop.permute.xlu2 %863  ;;  %1205 = vmatpush.msra.mxu2 %v929_v62  ;;  %1195 = vmatpush.msra.mxu1 %v932_v48 }
 0x144   :  { %1206 = vmatpush.msra.mxu3 %v929_v62  ;;  %999 = vmatpush.msra.mxu0 %v930_v61 }
 0x145   :  { %1208 = vmatpush.msra.mxu2 %v928_v1  ;;  %1198 = vmatpush.msra.mxu1 %v931_v54 }
 0x146   :  { %1209 = vmatpush.msra.mxu3 %v928_v1  ;;  %1000 = vmatpush.msra.mxu0 %v929_v62 }
 0x147   :  { %559 = vrot.lane.b32.xlu1 %v1430_v34, %s1282_s18  ;;  %1201 = vmatpush.msra.mxu1 %v930_v61 }
 0x148   :  { %488 = vrot.lane.b32.xlu0 %v732_v31, %s1281_s17  ;;  %1001 = vmatpush.msra.mxu0 %v928_v1  ;;  %s1154_s17 = sshll.u32 %s1952_s2, 4  ;;  %s1155_s17 = int_to_ptr.hbm [resolvable:$true] %s1154_s17 }
 0x149   :  { %v485_v3 = vpop.permute.xlu1 %484  ;;  %567 = vrot.lane.b32.xlu2 %v1452_v41, %s1282_s18  ;;  %1204 = vmatpush.msra.mxu1 %v929_v62 }
 0x14a   :  { %520 = vst.msk [vmem:[#allocation3 + $0x68] sm:$0xff] %vm506_vm5, %v485_v3  ;;  %v580_v45 = vpop.permute.xlu0 %579 }
 0x14b   :  { %616 = vst.msk [vmem:[#allocation3 + $0x60] sm:$0xff] %vm603_vm6, %v580_v45  ;;  %v564_v34 = vpop.permute.xlu2 %563  ;;  %1207 = vmatpush.msra.mxu1 %v928_v1 }
 0x14c   :  { %714 = vst.msk [vmem:[#allocation3 + $0x60] sm:$0xff] %vm701_vm7, %v678_v22 }
 0x14d   :  { %608 = vst.msk [vmem:[#allocation3 + $0x20] sm:$0xff] %vm603_vm6, %v564_v34 }
 0x14f   :  { %657 = vrot.lane.b32.xlu1 %v1515_v59, %s1283_s19 }
 0x150   :  { %577 = vrot.lane.b32.xlu0 %v1481_v49, %s1282_s18 }
 0x151   :  { %v670_v41 = vpop.permute.xlu1 %669  ;;  %665 = vrot.lane.b32.xlu2 %v1535_v0, %s1283_s19 }
 0x152   :  { %710 = vst.msk [vmem:[#allocation3 + $0x40] sm:$0xff] %vm701_vm7, %v670_v41  ;;  %v767_v5 = vpop.permute.xlu0 %766 }
 0x153   :  { %807 = vst.msk [vmem:[#allocation3 + $0x40] sm:$0xff] %vm798_vm9, %v767_v5  ;;  %v574_v24 = vpop.permute.xlu2 %573 }
 0x154   :  { %904 = vst.msk [vmem:[#allocation3 + $0x40] sm:$0xff] %vm895_vm8, %v864_v55 }
 0x155   :  { %613 = vst.msk [vmem:[#allocation3 + $0x48] sm:$0xff] %vm603_vm6, %v574_v24 }
 0x157   :  { %585 = vrot.lane.b32.xlu1 %v1745_v42, %s1282_s18 }
 0x158   :  { %762 = vrot.lane.b32.xlu0 %v1596_v40, %s1284_s20 }
 0x159   :  { %v775_v49 = vpop.permute.xlu1 %774  ;;  %754 = vrot.lane.b32.xlu2 %v1379_v19, %s1284_s20 }
 0x15a   :  { %811 = vst.msk [vmem:[#allocation3 + $0x60] sm:$0xff] %vm798_vm9, %v775_v49  ;;  %v872_v59 = vpop.permute.xlu0 %871 }
 0x15b   :  { %908 = vst.msk [vmem:[#allocation3 + $0x60] sm:$0xff] %vm895_vm8, %v872_v59  ;;  %v920_v0 = vld [vmem:[#allocation3 + $0x40] sm:$0xff]  ;;  %v759_v58 = vpop.permute.xlu2 %758 }
 0x15c   :  { %1175 = vmatmul.msk.f32.vlgmr.msra.gmra.mxu2 %vm937_vm10, %v920_v0 }
 0x15f   :  { %675 = vrot.lane.b32.xlu1 %v1554_v4, %s1283_s19 }
 0x160   :  { %851 = vrot.lane.b32.xlu0 %v1434_v36, %s1285_s21 }
 0x161   :  { %v556_v40 = vpop.permute.xlu1 %555  ;;  %683 = vrot.lane.b32.xlu2 %v636_v2, %s1283_s19 }
 0x162   :  { %604 = vst.msk [vmem:[#allocation3] sm:$0xff] %vm603_vm6, %v556_v40  ;;  %v654_v19 = vpop.permute.xlu0 %653  ;;  %v924_v30 = vld [vmem:[#allocation3 + $0x60] sm:$0xff] }
 0x163   :  { %702 = vst.msk [vmem:[#allocation3] sm:$0xff] %vm701_vm7, %v654_v19  ;;  %1179 = vmatmul.msk.f32.vlgmr.msra.gmra.mxu3 %vm937_vm10, %v924_v30  ;;  %v848_v6 = vpop.permute.xlu2 %847 }
 0x167   :  { %859 = vrot.lane.b32.xlu1 %v821_v7, %s1285_s21 }
 0x168   :  { %780 = vrot.lane.b32.xlu0 %v733_v33, %s1284_s20 }
 0x169   :  { %v662_v4 = vpop.permute.xlu1 %661  ;;  %772 = vrot.lane.b32.xlu2 %v1409_v28, %s1284_s20 }
 0x16a   :  { %706 = vst.msk [vmem:[#allocation3 + $0x20] sm:$0xff] %vm701_vm7, %v662_v4  ;;  %v582_v37 = vpop.permute.xlu0 %581 }
 0x16b   :  { %617 = vst.msk [vmem:[#allocation3 + $0x68] sm:$0xff] %vm603_vm6, %v582_v37  ;;  %v777_v8 = vpop.permute.xlu2 %776 }
 0x16c   :  { %803 = vst.msk [vmem:[#allocation3 + $0x20] sm:$0xff] %vm798_vm9, %v759_v58 }
 0x16f   :  { %869 = vrot.lane.b32.xlu1 %v1485_v51, %s1285_s21 }
 0x170   :  { %561 = vrot.lane.b32.xlu0 %v1434_v36, %s1282_s18 }
 0x171   :  { %v751_v47 = vpop.permute.xlu1 %750  ;;  %877 = vrot.lane.b32.xlu2 %v830_v43, %s1285_s21 }
 0x172   :  { %799 = vst.msk [vmem:[#allocation3] sm:$0xff] %vm798_vm9, %v751_v47  ;;  %v672_v28 = vpop.permute.xlu0 %671 }
 0x173   :  { %711 = vst.msk [vmem:[#allocation3 + $0x48] sm:$0xff] %vm701_vm7, %v672_v28  ;;  %v558_v50 = vpop.permute.xlu2 %557 }
 0x174   :  { %896 = vst.msk [vmem:[#allocation3] sm:$0xff] %vm895_vm8, %v848_v6 }
 0x175   :  { %605 = vst.msk [vmem:[#allocation3 + $0x8] sm:$0xff] %vm603_vm6, %v558_v50 }
 0x177   :  { %569 = vrot.lane.b32.xlu1 %v821_v7, %s1282_s18 }
 0x178   :  { %667 = vrot.lane.b32.xlu0 %v628_v13, %s1283_s19 }
 0x179   :  { %v680_v51 = vpop.permute.xlu1 %679  ;;  %659 = vrot.lane.b32.xlu2 %v1462_v44, %s1283_s19 }
 0x17a   :  { %715 = vst.msk [vmem:[#allocation3 + $0x68] sm:$0xff] %vm701_vm7, %v680_v51  ;;  %v856_v36 = vpop.permute.xlu0 %855 }
 0x17b   :  { %900 = vst.msk [vmem:[#allocation3 + $0x20] sm:$0xff] %vm895_vm8, %v856_v36  ;;  %v912_v17 = vld [vmem:[#allocation3] sm:$0xff]  ;;  %v656_v52 = vpop.permute.xlu2 %655 }
 0x17c   :  { %812 = vst.msk [vmem:[#allocation3 + $0x68] sm:$0xff] %vm798_vm9, %v777_v8  ;;  %1167 = vmatmul.msk.f32.vlgmr.msra.gmra.mxu0 %vm937_vm10, %v912_v17 }
 0x17d   :  { %703 = vst.msk [vmem:[#allocation3 + $0x8] sm:$0xff] %vm701_vm7, %v656_v52 }
 0x17f   :  { %756 = vrot.lane.b32.xlu1 %v1387_v23, %s1284_s20 }
 0x180   :  { %853 = vrot.lane.b32.xlu0 %v1432_v35, %s1285_s21 }
 0x181   :  { %v769_v44 = vpop.permute.xlu1 %768  ;;  %764 = vrot.lane.b32.xlu2 %v725_v60, %s1284_s20 }
 0x182   :  { %808 = vst.msk [vmem:[#allocation3 + $0x48] sm:$0xff] %vm798_vm9, %v769_v44  ;;  %v866_v10 = vpop.permute.xlu0 %865  ;;  %v916_v11 = vld [vmem:[#allocation3 + $0x20] sm:$0xff] }
 0x183   :  { %905 = vst.msk [vmem:[#allocation3 + $0x48] sm:$0xff] %vm895_vm8, %v866_v10  ;;  %1171 = vmatmul.msk.f32.vlgmr.msra.gmra.mxu1 %vm937_vm10, %v916_v11  ;;  %v584_v27 = vpop.permute.xlu2 %583 }
 0x187   :  { %861 = vrot.lane.b32.xlu1 %v822_v12, %s1285_s21 }
 0x189   :  { %v874_v14 = vpop.permute.xlu1 %873 }
 0x18a   :  { %909 = vst.msk [vmem:[#allocation3 + $0x68] sm:$0xff] %vm895_vm8, %v874_v14  ;;  %v566_v23 = vpop.permute.xlu0 %565  ;;  %v921_v35 = vld [vmem:[#allocation3 + $0x48] sm:$0xff] }
 0x18b   :  { %609 = vst.msk [vmem:[#allocation3 + $0x28] sm:$0xff] %vm603_vm6, %v566_v23  ;;  %1176 = vmatmul.msk.f32.gmra.mxu2 %vm937_vm10, %v921_v35  ;;  %v674_v15 = vpop.permute.xlu2 %673 }
 0x191   :  { %v487_v32 = vpop.permute.xlu1 %486  ;;  %v925_v39 = vld [vmem:[#allocation3 + $0x68] sm:$0xff] }
 0x192   :  { %521 = vst.msk [vmem:[#allocation3 + $0x70] sm:$0xff] %vm506_vm5, %v487_v32  ;;  %1180 = vmatmul.msk.f32.gmra.mxu3 %vm937_vm10, %v925_v39  ;;  %v664_v29 = vpop.permute.xlu0 %663 }
 0x193   :  { %707 = vst.msk [vmem:[#allocation3 + $0x28] sm:$0xff] %vm701_vm7, %v664_v29  ;;  %v858_v38 = vpop.permute.xlu2 %857 }
 0x194   :  { %618 = vst.msk [vmem:[#allocation3 + $0x70] sm:$0xff] %vm603_vm6, %v584_v27 }
 0x199   :  { %v576_v63 = vpop.permute.xlu1 %575 }
 0x19a   :  { %614 = vst.msk [vmem:[#allocation3 + $0x50] sm:$0xff] %vm603_vm6, %v576_v63  ;;  %v753_v46 = vpop.permute.xlu0 %752 }
 0x19b   :  { %800 = vst.msk [vmem:[#allocation3 + $0x8] sm:$0xff] %vm798_vm9, %v753_v46  ;;  %v868_v16 = vpop.permute.xlu2 %867 }
 0x19c   :  { %712 = vst.msk [vmem:[#allocation3 + $0x50] sm:$0xff] %vm701_vm7, %v674_v15 }
 0x1a1   :  { %v761_v57 = vpop.permute.xlu1 %760 }
 0x1a2   :  { %804 = vst.msk [vmem:[#allocation3 + $0x28] sm:$0xff] %vm798_vm9, %v761_v57  ;;  %v682_v20 = vpop.permute.xlu0 %681 }
 0x1a3   :  { %716 = vst.msk [vmem:[#allocation3 + $0x70] sm:$0xff] %vm701_vm7, %v682_v20  ;;  %v568_v56 = vpop.permute.xlu2 %567 }
 0x1a4   :  { %901 = vst.msk [vmem:[#allocation3 + $0x28] sm:$0xff] %vm895_vm8, %v858_v38 }
 0x1a5   :  { %610 = vst.msk [vmem:[#allocation3 + $0x30] sm:$0xff] %vm603_vm6, %v568_v56 }
 0x1a9   :  { %v850_v9 = vpop.permute.xlu1 %849 }
 0x1aa   :  { %897 = vst.msk [vmem:[#allocation3 + $0x8] sm:$0xff] %vm895_vm8, %v850_v9  ;;  %v771_v18 = vpop.permute.xlu0 %770 }
 0x1ab   :  { %809 = vst.msk [vmem:[#allocation3 + $0x50] sm:$0xff] %vm798_vm9, %v771_v18  ;;  %v917_v22 = vld [vmem:[#allocation3 + $0x28] sm:$0xff]  ;;  %v666_v25 = vpop.permute.xlu2 %665 }
 0x1ac   :  { %906 = vst.msk [vmem:[#allocation3 + $0x50] sm:$0xff] %vm895_vm8, %v868_v16  ;;  %1172 = vmatmul.msk.f32.gmra.mxu1 %vm937_vm10, %v917_v22 }
 0x1ad   :  { %708 = vst.msk [vmem:[#allocation3 + $0x30] sm:$0xff] %vm701_vm7, %v666_v25 }
 0x1b1   :  { %v779_v26 = vpop.permute.xlu1 %778  ;;  %v913_v31 = vld [vmem:[#allocation3 + $0x8] sm:$0xff] }
 0x1b2   :  { %813 = vst.msk [vmem:[#allocation3 + $0x70] sm:$0xff] %vm798_vm9, %v779_v26  ;;  %v876_v42 = vpop.permute.xlu0 %875  ;;  %1168 = vmatmul.msk.f32.gmra.mxu0 %vm937_vm10, %v913_v31 }
 0x1b3   :  { %910 = vst.msk [vmem:[#allocation3 + $0x70] sm:$0xff] %vm895_vm8, %v876_v42  ;;  %v922_v48 = vld [vmem:[#allocation3 + $0x50] sm:$0xff]  ;;  %v755_v53 = vpop.permute.xlu2 %754 }
 0x1b4   :  { %1177 = vmatmul.msk.f32.gmra.mxu2 %vm937_vm10, %v922_v48 }
 0x1b9   :  { %v560_v54 = vpop.permute.xlu1 %559 }
 0x1ba   :  { %606 = vst.msk [vmem:[#allocation3 + $0x10] sm:$0xff] %vm603_vm6, %v560_v54  ;;  %v489_v21 = vpop.permute.xlu0 %488  ;;  %v926_v55 = vld [vmem:[#allocation3 + $0x70] sm:$0xff] }
 0x1bb   :  { %522 = vst.msk [vmem:[#allocation3 + $0x78] sm:$0xff] %vm506_vm5, %v489_v21  ;;  %1181 = vmatmul.msk.f32.gmra.mxu3 %vm937_vm10, %v926_v55  ;;  %v684_v62 = vpop.permute.xlu2 %683 }
 0x1c1   :  { %v658_v61 = vpop.permute.xlu1 %657 }
 0x1c2   :  { %704 = vst.msk [vmem:[#allocation3 + $0x10] sm:$0xff] %vm701_vm7, %v658_v61  ;;  %v578_v1 = vpop.permute.xlu0 %577 }
 0x1c3   :  { %615 = vst.msk [vmem:[#allocation3 + $0x58] sm:$0xff] %vm603_vm6, %v578_v1  ;;  %v773_v34 = vpop.permute.xlu2 %772 }
 0x1c4   :  { %801 = vst.msk [vmem:[#allocation3 + $0x10] sm:$0xff] %vm798_vm9, %v755_v53 }
 0x1c9   :  { %v586_v3 = vpop.permute.xlu1 %585 }
 0x1ca   :  { %619 = vst.msk [vmem:[#allocation3 + $0x78] sm:$0xff] %vm603_vm6, %v586_v3  ;;  %v763_v45 = vpop.permute.xlu0 %762 }
 0x1cb   :  { %805 = vst.msk [vmem:[#allocation3 + $0x30] sm:$0xff] %vm798_vm9, %v763_v45  ;;  %v878_v24 = vpop.permute.xlu2 %877 }
 0x1cc   :  { %717 = vst.msk [vmem:[#allocation3 + $0x78] sm:$0xff] %vm701_vm7, %v684_v62 }
 0x1d1   :  { %v676_v41 = vpop.permute.xlu1 %675 }
 0x1d2   :  { %713 = vst.msk [vmem:[#allocation3 + $0x58] sm:$0xff] %vm701_vm7, %v676_v41  ;;  %v852_v5 = vpop.permute.xlu0 %851 }
 0x1d3   :  { %898 = vst.msk [vmem:[#allocation3 + $0x10] sm:$0xff] %vm895_vm8, %v852_v5  ;;  %v660_v2 = vpop.permute.xlu2 %659 }
 0x1d4   :  { %810 = vst.msk [vmem:[#allocation3 + $0x58] sm:$0xff] %vm798_vm9, %v773_v34 }
 0x1d9   :  { %v860_v49 = vpop.permute.xlu1 %859 }
 0x1da   :  { %902 = vst.msk [vmem:[#allocation3 + $0x30] sm:$0xff] %vm895_vm8, %v860_v49  ;;  %v781_v59 = vpop.permute.xlu0 %780  ;;  %v914_v0 = vld [vmem:[#allocation3 + $0x10] sm:$0xff] }
 0x1db   :  { %814 = vst.msk [vmem:[#allocation3 + $0x78] sm:$0xff] %vm798_vm9, %v781_v59  ;;  %1169 = vmatmul.msk.f32.gmra.mxu0 %vm937_vm10, %v914_v0  ;;  %v765_v37 = vpop.permute.xlu2 %764 }
 0x1dc   :  { %911 = vst.msk [vmem:[#allocation3 + $0x78] sm:$0xff] %vm895_vm8, %v878_v24 }
 0x1df   :  { %v1027_v58 = vpop.f32.mrf.mxu2 }
 0x1e0   :  { %1059 = vst.msk [vmem:[#allocation7 + $0x80] sm:$0xff] %vm28_vm0, %v1027_v58 }
 0x1e1   :  { %v870_v40 = vpop.permute.xlu1 %869  ;;  %v918_v19 = vld [vmem:[#allocation3 + $0x30] sm:$0xff] }
 0x1e2   :  { %907 = vst.msk [vmem:[#allocation3 + $0x58] sm:$0xff] %vm895_vm8, %v870_v40  ;;  %1173 = vmatmul.msk.f32.gmra.mxu1 %vm937_vm10, %v918_v19  ;;  %v562_v30 = vpop.permute.xlu0 %561 }
 0x1e3   :  { %607 = vst.msk [vmem:[#allocation3 + $0x18] sm:$0xff] %vm603_vm6, %v562_v30  ;;  %v927_v6 = vld [vmem:[#allocation3 + $0x78] sm:$0xff] }
 0x1e4   :  { %705 = vst.msk [vmem:[#allocation3 + $0x18] sm:$0xff] %vm701_vm7, %v660_v2  ;;  %1182 = vmatmul.msk.f32.gmra.mxu3 %vm937_vm10, %v927_v6 }
 0x1e6   :  { %v1884_v7 = vpop.f32.mrf.mxu3 }
 0x1e7   :  { %1063 = vst.msk [vmem:[#allocation7 + $0xc0] sm:$0xff] %vm28_vm0, %v1884_v7 }
 0x1e9   :  { %v570_v33 = vpop.permute.xlu1 %569  ;;  %v923_v4 = vld [vmem:[#allocation3 + $0x58] sm:$0xff] }
 0x1ea   :  { %611 = vst.msk [vmem:[#allocation3 + $0x38] sm:$0xff] %vm603_vm6, %v570_v33  ;;  %1178 = vmatmul.msk.f32.gmra.mxu2 %vm937_vm10, %v923_v4  ;;  %v668_v8 = vpop.permute.xlu0 %667 }
 0x1eb   :  { %709 = vst.msk [vmem:[#allocation3 + $0x38] sm:$0xff] %vm701_vm7, %v668_v8 }
 0x1ec   :  { %806 = vst.msk [vmem:[#allocation3 + $0x38] sm:$0xff] %vm798_vm9, %v765_v37 }
 0x1f1   :  { %v757_v43 = vpop.permute.xlu1 %756 }
 0x1f2   :  { %802 = vst.msk [vmem:[#allocation3 + $0x18] sm:$0xff] %vm798_vm9, %v757_v43  ;;  %v854_v47 = vpop.permute.xlu0 %853 }
 0x1f3   :  { %899 = vst.msk [vmem:[#allocation3 + $0x18] sm:$0xff] %vm895_vm8, %v854_v47 }
 0x1f9   :  { %v862_v28 = vpop.permute.xlu1 %861  ;;  %v1003_v50 = vpop.f32.mrf.mxu0 }
 0x1fa   :  { %903 = vst.msk [vmem:[#allocation3 + $0x38] sm:$0xff] %vm895_vm8, %v862_v28  ;;  %v915_v13 = vld [vmem:[#allocation3 + $0x18] sm:$0xff]  ;;  %1083 = vrot.lane.b32.xlu2 %v1003_v50, %s1286_s1 }
 0x1fb   :  { %1170 = vmatmul.msk.f32.gmra.mxu0 %vm937_vm10, %v915_v13  ;;  %1051 = vst.msk [vmem:[#allocation7] sm:$0xff] %vm28_vm0, %v1003_v50 }
 0x200   :  { %v1015_v51 = vpop.f32.mrf.mxu1 }
 0x201   :  { %v919_v36 = vld [vmem:[#allocation3 + $0x38] sm:$0xff]  ;;  %1055 = vst.msk [vmem:[#allocation7 + $0x40] sm:$0xff] %vm28_vm0, %v1015_v51 }
 0x202   :  { %1174 = vmatmul.msk.f32.gmra.mxu1 %vm937_vm10, %v919_v36 }
 0x20e   :  { %v1030_v17 = vpop.f32.mrf.mxu2 }
 0x20f   :  { %1060 = vst.msk [vmem:[#allocation7 + $0x90] sm:$0xff] %vm28_vm0, %v1030_v17 }
 0x215   :  { %v1042_v52 = vpop.f32.mrf.mxu3 }
 0x216   :  { %1064 = vst.msk [vmem:[#allocation7 + $0xd0] sm:$0xff] %vm28_vm0, %v1042_v52 }
 0x229   :  { %v1018_v60 = vpop.f32.mrf.mxu1 }
 0x22a   :  { %1056 = vst.msk [vmem:[#allocation7 + $0x50] sm:$0xff] %vm28_vm0, %v1018_v60 }
 0x22f   :  { %v1006_v44 = vpop.f32.mrf.mxu0 }
 0x230   :  { %1052 = vst.msk [vmem:[#allocation7 + $0x10] sm:$0xff] %vm28_vm0, %v1006_v44  ;;  %1085 = vrot.lane.b32.xlu0 %v1006_v44, %s1286_s1 }
 0x237   :  { %v1033_v10 = vpop.f32.mrf.mxu2 }
 0x238   :  { %1091 = vrot.lane.b32.xlu0 %v1015_v51, %s1286_s1  ;;  %1061 = vst.msk [vmem:[#allocation7 + $0xa0] sm:$0xff] %vm28_vm0, %v1033_v10 }
 0x23e   :  { %v1045_v11 = vpop.f32.mrf.mxu3 }
 0x23f   :  { %1065 = vst.msk [vmem:[#allocation7 + $0xe0] sm:$0xff] %vm28_vm0, %v1045_v11 }
 0x254   :  { %v1084_v27 = vpop.permute.xlu2 %1083 }
 0x255   :  { %1132 = vst.msk [vmem:[#allocation7 + $0x8] sm:$0xff] %vm28_vm0, %v1084_v27 }
 0x258   :  { %v1009_v12 = vpop.f32.mrf.mxu0 }
 0x259   :  { %1053 = vst.msk [vmem:[#allocation7 + $0x20] sm:$0xff] %vm28_vm0, %v1009_v12  ;;  %1087 = vrot.lane.b32.xlu1 %v1009_v12, %s1286_s1 }
 0x25f   :  { %v1021_v14 = vpop.f32.mrf.mxu1 }
 0x260   :  { %1057 = vst.msk [vmem:[#allocation7 + $0x60] sm:$0xff] %vm28_vm0, %v1021_v14 }
 0x261   :  { %1093 = vrot.lane.b32.xlu1 %v1018_v60, %s1286_s1 }
 0x267   :  { %v1048_v23 = vpop.f32.mrf.mxu3 }
 0x268   :  { %1066 = vst.msk [vmem:[#allocation7 + $0xf0] sm:$0xff] %vm28_vm0, %v1048_v23 }
 0x269   :  { %1099 = vrot.lane.b32.xlu1 %v1027_v58, %s1286_s1 }
 0x26d   :  { %v1036_v35 = vpop.f32.mrf.mxu2 }
 0x26e   :  { %1062 = vst.msk [vmem:[#allocation7 + $0xb0] sm:$0xff] %vm28_vm0, %v1036_v35 }
 0x271   :  { %1105 = vrot.lane.b32.xlu1 %v1036_v35, %s1286_s1 }
 0x278   :  { %v1012_v15 = vpop.f32.mrf.mxu0 }
 0x279   :  { %1054 = vst.msk [vmem:[#allocation7 + $0x30] sm:$0xff] %vm28_vm0, %v1012_v15  ;;  %1111 = vrot.lane.b32.xlu1 %v1045_v11, %s1286_s1  ;;  %1089 = vrot.lane.b32.xlu2 %v1012_v15, %s1286_s1 }
 0x27f   :  { %v1024_v32 = vpop.f32.mrf.mxu1 }
 0x280   :  { %1058 = vst.msk [vmem:[#allocation7 + $0x70] sm:$0xff] %vm28_vm0, %v1024_v32  ;;  %1097 = vrot.lane.b32.xlu0 %v1024_v32, %s1286_s1 }
 0x281   :  { %1095 = vrot.lane.b32.xlu2 %v1021_v14, %s1286_s1 }
 0x288   :  { %1103 = vrot.lane.b32.xlu0 %v1033_v10, %s1286_s1 }
 0x289   :  { %1101 = vrot.lane.b32.xlu2 %v1030_v17, %s1286_s1 }
 0x290   :  { %1109 = vrot.lane.b32.xlu0 %v1042_v52, %s1286_s1 }
 0x291   :  { %1107 = vrot.lane.b32.xlu2 %v1884_v7, %s1286_s1 }
 0x299   :  { %1113 = vrot.lane.b32.xlu2 %v1048_v23, %s1286_s1 }
 0x2a2   :  { %v1086_v39 = vpop.permute.xlu0 %1085 }
 0x2a3   :  { %1133 = vst.msk [vmem:[#allocation7 + $0x18] sm:$0xff] %vm28_vm0, %v1086_v39 }
 0x2aa   :  { %v1092_v29 = vpop.permute.xlu0 %1091 }
 0x2ab   :  { %1136 = vst.msk [vmem:[#allocation7 + $0x48] sm:$0xff] %vm28_vm0, %v1092_v29 }
 0x2cb   :  { %v1088_v38 = vpop.permute.xlu1 %1087 }
 0x2cc   :  { %1134 = vst.msk [vmem:[#allocation7 + $0x28] sm:$0xff] %vm28_vm0, %v1088_v38 }
 0x2d3   :  { %v1094_v63 = vpop.permute.xlu1 %1093  ;;  %v1090_v46 = vpop.permute.xlu2 %1089 }
 0x2d4   :  { %1137 = vst.msk [vmem:[#allocation7 + $0x58] sm:$0xff] %vm28_vm0, %v1094_v63 }
 0x2d5   :  { %1135 = vst.msk [vmem:[#allocation7 + $0x38] sm:$0xff] %vm28_vm0, %v1090_v46 }
 0x2db   :  { %v1100_v16 = vpop.permute.xlu1 %1099  ;;  %v1096_v57 = vpop.permute.xlu2 %1095 }
 0x2dc   :  { %1140 = vst.msk [vmem:[#allocation7 + $0x88] sm:$0xff] %vm28_vm0, %v1100_v16 }
 0x2dd   :  { %1138 = vst.msk [vmem:[#allocation7 + $0x68] sm:$0xff] %vm28_vm0, %v1096_v57 }
 0x2e3   :  { %v1106_v20 = vpop.permute.xlu1 %1105  ;;  %v1102_v56 = vpop.permute.xlu2 %1101 }
 0x2e4   :  { %1143 = vst.msk [vmem:[#allocation7 + $0xb8] sm:$0xff] %vm28_vm0, %v1106_v20 }
 0x2e5   :  { %1141 = vst.msk [vmem:[#allocation7 + $0x98] sm:$0xff] %vm28_vm0, %v1102_v56 }
 0x2eb   :  { %v1112_v9 = vpop.permute.xlu1 %1111  ;;  %v1108_v18 = vpop.permute.xlu2 %1107 }
 0x2ec   :  { %1146 = vst.msk [vmem:[#allocation7 + $0xe8] sm:$0xff] %vm28_vm0, %v1112_v9 }
 0x2ed   :  { %1144 = vst.msk [vmem:[#allocation7 + $0xc8] sm:$0xff] %vm28_vm0, %v1108_v18 }
 0x2f2   :  { %v1098_v22 = vpop.permute.xlu0 %1097 }
 0x2f3   :  { %1139 = vst.msk [vmem:[#allocation7 + $0x78] sm:$0xff] %vm28_vm0, %v1098_v22  ;;  %v1114_v25 = vpop.permute.xlu2 %1113 }
 0x2f4   :  { %1147 = vst.msk [vmem:[#allocation7 + $0xf8] sm:$0xff] %vm28_vm0, %v1114_v25 }
 0x2fa   :  { %v1104_v26 = vpop.permute.xlu0 %1103 }
 0x2fb   :  { %1142 = vst.msk [vmem:[#allocation7 + $0xa8] sm:$0xff] %vm28_vm0, %v1104_v26 }
 0x302   :  { %v1110_v31 = vpop.permute.xlu0 %1109 }
 0x303   :  { %1145 = vst.msk [vmem:[#allocation7 + $0xd8] sm:$0xff] %vm28_vm0, %v1110_v31 }
 0x304   :  { %1160 = dma.vmem_to_hbm [thread:$0]  %s1153_s13, 4096, %s1155_s17, [#allocation6], %s1276_s14, %s1276_s14, %s1277_s15  }
 0x305   :  { %1273 = dma.done.wait [#allocation6], 4096  }
 0x306   :  { %1274 = vsyncadd [#allocation6], 4294963200 }
 0x307   :  { %1165 = vsyncpa [#allocation5], 1 }
 0x308   :  { %1166 = vsyncpa [#allocation6], 1 }

</bundles_post_ra>
